<compile_context>
chip_gen: v7x
topology: tpu7x:2x2x1
jax: 0.10.0
libtpu: 0.0.40
codegen_flags: <defaults>
</compile_context>

<pallas_src>
import functools

import jax
import jax.numpy as jnp
from jax import lax
from jax.experimental import pallas as pl
from jax.experimental.pallas import tpu as pltpu

_EPS = 1e-5
_SQRT3 = 1.7320508075688772


def _fused_kernel(x_ref, w_ref, o_ref, *, eps, inv_d):
    """Fused EquivariantLayerNorm forward for one (TB, 3, D) block.

    x_ref: (TB, 3, D)   w_ref: (1, D)   o_ref: (TB, 3, D)
    """
    w = w_ref[...].astype(jnp.float32)                       # (1, D), broadcasts over TB

    # ---- mean-center each vector component (lane reduction over D) ----
    x0 = x_ref[:, 0, :].astype(jnp.float32)                  # (TB, D)
    x1 = x_ref[:, 1, :].astype(jnp.float32)
    x2 = x_ref[:, 2, :].astype(jnp.float32)
    xc0 = x0 - jnp.mean(x0, axis=-1, keepdims=True)
    xc1 = x1 - jnp.mean(x1, axis=-1, keepdims=True)
    xc2 = x2 - jnp.mean(x2, axis=-1, keepdims=True)

    # ---- regularized covariance A = (1/D) xc xc^T + eps*diag(1,2,3); 6 unique (TB,1) entries ----
    # VPU products + XLU lane reductions (an MXU contraction with K=D, N=3 would use <1%
    # of the systolic array).
    a00 = jnp.sum(xc0 * xc0, axis=-1, keepdims=True) * inv_d + eps * 1.0
    a01 = jnp.sum(xc0 * xc1, axis=-1, keepdims=True) * inv_d
    a02 = jnp.sum(xc0 * xc2, axis=-1, keepdims=True) * inv_d
    a11 = jnp.sum(xc1 * xc1, axis=-1, keepdims=True) * inv_d + eps * 2.0
    a12 = jnp.sum(xc1 * xc2, axis=-1, keepdims=True) * inv_d
    a22 = jnp.sum(xc2 * xc2, axis=-1, keepdims=True) * inv_d + eps * 3.0

    # ---- closed-form eigenvalues of the symmetric 3x3 A (per batch row) ----
    q = (a00 + a11 + a22) * (1.0 / 3.0)
    b00 = a00 - q
    b11 = a11 - q
    b22 = a22 - q
    p2 = (b00 * b00 + b11 * b11 + b22 * b22
          + 2.0 * (a01 * a01 + a02 * a02 + a12 * a12))
    p = jnp.sqrt(p2 * (1.0 / 6.0))
    # p >= eps/sqrt(3) whenever the data is isotropic (the regularizer alone provides
    # spread); the guard below only protects the exact-zero corner.
    inv_p = jnp.where(p > 1e-20, 1.0 / jnp.maximum(p, 1e-20), 0.0)
    c00 = b00 * inv_p
    c11 = b11 * inv_p
    c22 = b22 * inv_p
    c01 = a01 * inv_p
    c02 = a02 * inv_p
    c12 = a12 * inv_p
    # r = det((A - q I)/p) / 2 in [-1, 1]; eigenvalues are q + 2 p cos(arccos(r)/3 + 2pi k/3).
    r = 0.5 * (c00 * (c11 * c22 - c12 * c12)
               - c01 * (c01 * c22 - c12 * c02)
               + c02 * (c01 * c12 - c11 * c02))
    r = jnp.clip(r, -1.0, 1.0)

    # cos(arccos(r)/3) is the root of 4c^3 - 3c = r in [1/2, 1]: Newton from an upper
    # starting point (monotone descent on a convex increasing g), hybrid initial guess
    # near the degenerate corner r -> -1.  Avoids arccos/cos lowering entirely.
    c_lo_guess = 0.5 + jnp.sqrt(jnp.maximum(1.0 + r, 0.0) * (1.0 / 6.0))
    c = jnp.where(r < -0.5, c_lo_guess, jnp.ones_like(r))
    for _ in range(7):                                        # unrolled at trace time
        c2 = c * c
        g = c * (4.0 * c2 - 3.0) - r
        dg = jnp.maximum(12.0 * c2 - 3.0, 1e-6)
        c = c - g / dg
    c = jnp.clip(c, 0.5, 1.0)
    s = jnp.sqrt(jnp.maximum(1.0 - c * c, 0.0))

    lam1 = q + 2.0 * p * c                                    # largest eigenvalue
    lam3 = q - p * (c + _SQRT3 * s)                           # smallest
    lam2 = 3.0 * q - lam1 - lam3                              # middle (trace identity)

    # ---- f(A) = (A + eps I)^(-1/2)  ==  V diag(1/sqrt(s + eps)) V^T of the reference ----
    f1 = lax.rsqrt(jnp.maximum(lam1 + eps, 1e-20))
    f2 = lax.rsqrt(jnp.maximum(lam2 + eps, 1e-20))
    f3 = lax.rsqrt(jnp.maximum(lam3 + eps, 1e-20))

    # Newton divided differences with analytic f'/f'' fallbacks for (near-)degenerate
    # eigenvalue pairs -> no 1/gap amplification, robust in f32.
    rel = 4e-4
    d12 = lam1 - lam2
    d23 = lam2 - lam3
    d13 = lam1 - lam3
    tau12 = rel * (jnp.abs(lam1) + jnp.abs(lam2) + 2.0 * eps)
    tau23 = rel * (jnp.abs(lam2) + jnp.abs(lam3) + 2.0 * eps)
    tau13 = rel * (jnp.abs(lam1) + jnp.abs(lam3) + 2.0 * eps)

    fm12 = lax.rsqrt(jnp.maximum(0.5 * (lam1 + lam2) + eps, 1e-20))
    fm23 = lax.rsqrt(jnp.maximum(0.5 * (lam2 + lam3) + eps, 1e-20))
    g12 = jnp.where(d12 > tau12,
                    (f1 - f2) / jnp.maximum(d12, 1e-30),
                    -0.5 * fm12 * fm12 * fm12)                # f'((l1+l2)/2)
    g23 = jnp.where(d23 > tau23,
                    (f2 - f3) / jnp.maximum(d23, 1e-30),
                    -0.5 * fm23 * fm23 * fm23)
    f2_sq = f2 * f2
    h = jnp.where(d13 > tau13,
                  (g12 - g23) / jnp.maximum(d13, 1e-30),
                  0.375 * f2_sq * f2_sq * f2)                 # f''(l2)/2

    # ---- apply  y = [f1 I + g12 (A - l1 I) + h (A - l1 I)(A - l2 I)] xc * w ----
    # Horner on (TB, D) slabs with per-row (TB, 1) broadcast scalars.
    t0 = a00 * xc0 + a01 * xc1 + a02 * xc2 - lam2 * xc0       # (A - l2 I) xc
    t1 = a01 * xc0 + a11 * xc1 + a12 * xc2 - lam2 * xc1
    t2 = a02 * xc0 + a12 * xc1 + a22 * xc2 - lam2 * xc2
    u0 = g12 * xc0 + h * t0
    u1 = g12 * xc1 + h * t1
    u2 = g12 * xc2 + h * t2
    v0 = a00 * u0 + a01 * u1 + a02 * u2 - lam1 * u0           # (A - l1 I) u
    v1 = a01 * u0 + a11 * u1 + a12 * u2 - lam1 * u1
    v2 = a02 * u0 + a12 * u1 + a22 * u2 - lam1 * u2
    y0 = (f1 * xc0 + v0) * w
    y1 = (f1 * xc1 + v1) * w
    y2 = (f1 * xc2 + v2) * w

    # Single full-block, lane-dense store (fewer vst issues than per-component stores).
    o_ref[...] = jnp.stack([y0, y1, y2], axis=1).astype(o_ref.dtype)


def _round_up(v, m):
    return -(-v // m) * m


def _pick_block_batch(n, d):
    """Pick TB (batch rows per grid step)."""
    # VMEM per grid step ~= (x in + y out) * 2 pipeline buffers * (tb, 8, D) f32 blocks
    # (the (3, D) slab pads to 8 sublanes) plus ~a dozen live (tb, D) f32 temporaries in
    # the kernel body.  A ~12 MiB budget stays inside every generation's scoped-VMEM
    # default (16 MiB v5e, 32 MiB v6e, 32-of-64 MiB v7x).
    budget = 12 * 1024 * 1024
    per_row = (2 * 2 * 8 + 12) * d * 4
    tb = min(512, budget // per_row)
    tb = max(8, tb - tb % 8)
    # Keep >= 2 grid steps when possible so the "parallel" axis can shard across both
    # TensorCores on v7x (v5e/v6e have a single TC, so this costs nothing there).
    if n > 8 and 2 * tb > n:
        tb = _round_up(_round_up(n, 2) // 2, 8)
    tb = min(tb, _round_up(n, 8))
    return max(tb, 8)


def equivariant_layer_norm(x, weight, eps=_EPS, block_batch=None):
    """x: (N, 3, D), weight: (D,) -> (N, 3, D) float32."""
    N, n, D = x.shape
    assert n == 3, "reference module hard-codes a 3x3 regularizer (3-D vectors)"
    x = x.astype(jnp.float32)
    weight = weight.astype(jnp.float32).reshape(1, D)

    tb = block_batch or _pick_block_batch(N, D)
    grid = (pl.cdiv(N, tb),)

    return pl.pallas_call(
        functools.partial(_fused_kernel, eps=float(eps), inv_d=1.0 / D),
        grid=grid,
        in_specs=[pl.BlockSpec((tb, 3, D), lambda b: (b, 0, 0)),
                  pl.BlockSpec((1, D), lambda b: (0, 0))],
        out_specs=pl.BlockSpec((tb, 3, D), lambda b: (b, 0, 0)),
        out_shape=jax.ShapeDtypeStruct((N, 3, D), jnp.float32),
        compiler_params=pltpu.CompilerParams(
            dimension_semantics=("parallel",),
            vmem_limit_bytes=32 * 1024 * 1024,   # well under physical VMEM on v5e/v6e/v7x
        ),
    )(x, weight)


def _reference(x, weight, eps=_EPS):
    """Pure-JAX (f32) reference matching the PyTorch forward (modulo f64)."""
    x = x.astype(jnp.float32)
    N, _, D = x.shape
    xc = x - x.mean(-1, keepdims=True)
    cov = jnp.einsum('bnd,bmd->bnm', xc, xc, precision="highest") / D
    cov = cov + eps * jnp.diag(jnp.array([1.0, 2.0, 3.0], jnp.float32))
    s, v = jnp.linalg.eigh(cov)
    m = jnp.einsum('bij,bj,bkj->bik', v, 1.0 / jnp.sqrt(s + eps), v)
    return jnp.einsum('bij,bjd->bid', m, xc, precision="highest") * weight.reshape(1, 1, D)


if __name__ == "__main__":
    key = jax.random.PRNGKey(0)
    kx, kw = jax.random.split(key)
    N, n, D = 16, 3, 128                                   # normalized_shape = D = 128
    x = jax.random.normal(kx, (N, n, D), dtype=jnp.float32)
    # module initializes weight to ones; use a perturbed weight to exercise the scale path
    weight = 1.0 + 0.1 * jax.random.normal(kw, (D,), dtype=jnp.float32)

    out = equivariant_layer_norm(x, weight)
    out = jax.block_until_ready(out)

    ref = _reference(x, weight)
    assert out.shape == (N, n, D) and out.dtype == jnp.float32
    assert jnp.allclose(out, ref, atol=1e-2, rtol=1e-2), "mismatch vs JAX reference"
    print("KERNEL_OK")
</pallas_src>

<mosaic_0001>
module attributes {stable_mosaic.version = 11 : i64} {
  func.func @_fused_kernel(%arg0: i32, %arg1: memref<8x3x128xf32, #tpu.memory_space<vmem>>, %arg2: memref<1x128xf32, #tpu.memory_space<vmem>>, %arg3: memref<8x3x128xf32, #tpu.memory_space<vmem>>) attributes {dimension_semantics = [#tpu.dimension_semantics<parallel>], iteration_bounds = array<i64: 2>, scalar_prefetch = 0 : i64, scratch_operands = 0 : i64, tpu.core_type = #tpu.core_type<tc>, window_params = [{transform_indices = @transform_0, window_bounds = array<i64: 8, 3, 128>}, {pipeline_mode = #tpu.pipeline_mode<synchronous>, transform_indices = @transform_1, window_bounds = array<i64: 1, 128>}, {transform_indices = @transform_2, window_bounds = array<i64: 8, 3, 128>}]} {
    %c0 = arith.constant 0 : index
    %c0_0 = arith.constant 0 : index
    %0 = vector.load %arg2[%c0, %c0_0] : memref<1x128xf32, #tpu.memory_space<vmem>>, vector<1x128xf32>
    %c0_1 = arith.constant 0 : index
    %c0_2 = arith.constant 0 : index
    %c0_3 = arith.constant 0 : index
    %1 = vector.load %arg1[%c0_1, %c0_2, %c0_3] : memref<8x3x128xf32, #tpu.memory_space<vmem>>, vector<8x1x128xf32>
    %2 = vector.shape_cast %1 : vector<8x1x128xf32> to vector<8x128xf32>
    %c0_4 = arith.constant 0 : index
    %c1 = arith.constant 1 : index
    %c0_5 = arith.constant 0 : index
    %3 = vector.load %arg1[%c0_4, %c1, %c0_5] : memref<8x3x128xf32, #tpu.memory_space<vmem>>, vector<8x1x128xf32>
    %4 = vector.shape_cast %3 : vector<8x1x128xf32> to vector<8x128xf32>
    %c0_6 = arith.constant 0 : index
    %c2 = arith.constant 2 : index
    %c0_7 = arith.constant 0 : index
    %5 = vector.load %arg1[%c0_6, %c2, %c0_7] : memref<8x3x128xf32, #tpu.memory_space<vmem>>, vector<8x1x128xf32>
    %6 = vector.shape_cast %5 : vector<8x1x128xf32> to vector<8x128xf32>
    %cst = arith.constant dense<0.000000e+00> : vector<8xf32>
    %7 = vector.multi_reduction <add>, %2, %cst [1] : vector<8x128xf32> to vector<8xf32>
    %8 = vector.shape_cast %7 : vector<8xf32> to vector<8x1xf32>
    %cst_8 = arith.constant 1.280000e+02 : f32
    %9 = vector.broadcast %cst_8 : f32 to vector<8x1xf32>
    %10 = arith.divf %8, %9 : vector<8x1xf32>
    %11 = vector.broadcast %10 : vector<8x1xf32> to vector<8x128xf32>
    %12 = arith.subf %2, %11 : vector<8x128xf32>
    %cst_9 = arith.constant dense<0.000000e+00> : vector<8xf32>
    %13 = vector.multi_reduction <add>, %4, %cst_9 [1] : vector<8x128xf32> to vector<8xf32>
    %14 = vector.shape_cast %13 : vector<8xf32> to vector<8x1xf32>
    %cst_10 = arith.constant 1.280000e+02 : f32
    %15 = vector.broadcast %cst_10 : f32 to vector<8x1xf32>
    %16 = arith.divf %14, %15 : vector<8x1xf32>
    %17 = vector.broadcast %16 : vector<8x1xf32> to vector<8x128xf32>
    %18 = arith.subf %4, %17 : vector<8x128xf32>
    %cst_11 = arith.constant dense<0.000000e+00> : vector<8xf32>
    %19 = vector.multi_reduction <add>, %6, %cst_11 [1] : vector<8x128xf32> to vector<8xf32>
    %20 = vector.shape_cast %19 : vector<8xf32> to vector<8x1xf32>
    %cst_12 = arith.constant 1.280000e+02 : f32
    %21 = vector.broadcast %cst_12 : f32 to vector<8x1xf32>
    %22 = arith.divf %20, %21 : vector<8x1xf32>
    %23 = vector.broadcast %22 : vector<8x1xf32> to vector<8x128xf32>
    %24 = arith.subf %6, %23 : vector<8x128xf32>
    %25 = arith.mulf %12, %12 : vector<8x128xf32>
    %cst_13 = arith.constant dense<0.000000e+00> : vector<8xf32>
    %26 = vector.multi_reduction <add>, %25, %cst_13 [1] : vector<8x128xf32> to vector<8xf32>
    %27 = vector.shape_cast %26 : vector<8xf32> to vector<8x1xf32>
    %cst_14 = arith.constant 7.812500e-03 : f32
    %28 = vector.broadcast %cst_14 : f32 to vector<8x1xf32>
    %29 = arith.mulf %27, %28 : vector<8x1xf32>
    %cst_15 = arith.constant 9.99999974E-6 : f32
    %30 = vector.broadcast %cst_15 : f32 to vector<8x1xf32>
    %31 = arith.addf %29, %30 : vector<8x1xf32>
    %32 = arith.mulf %12, %18 : vector<8x128xf32>
    %cst_16 = arith.constant dense<0.000000e+00> : vector<8xf32>
    %33 = vector.multi_reduction <add>, %32, %cst_16 [1] : vector<8x128xf32> to vector<8xf32>
    %34 = vector.shape_cast %33 : vector<8xf32> to vector<8x1xf32>
    %cst_17 = arith.constant 7.812500e-03 : f32
    %35 = vector.broadcast %cst_17 : f32 to vector<8x1xf32>
    %36 = arith.mulf %34, %35 : vector<8x1xf32>
    %37 = arith.mulf %12, %24 : vector<8x128xf32>
    %cst_18 = arith.constant dense<0.000000e+00> : vector<8xf32>
    %38 = vector.multi_reduction <add>, %37, %cst_18 [1] : vector<8x128xf32> to vector<8xf32>
    %39 = vector.shape_cast %38 : vector<8xf32> to vector<8x1xf32>
    %cst_19 = arith.constant 7.812500e-03 : f32
    %40 = vector.broadcast %cst_19 : f32 to vector<8x1xf32>
    %41 = arith.mulf %39, %40 : vector<8x1xf32>
    %42 = arith.mulf %18, %18 : vector<8x128xf32>
    %cst_20 = arith.constant dense<0.000000e+00> : vector<8xf32>
    %43 = vector.multi_reduction <add>, %42, %cst_20 [1] : vector<8x128xf32> to vector<8xf32>
    %44 = vector.shape_cast %43 : vector<8xf32> to vector<8x1xf32>
    %cst_21 = arith.constant 7.812500e-03 : f32
    %45 = vector.broadcast %cst_21 : f32 to vector<8x1xf32>
    %46 = arith.mulf %44, %45 : vector<8x1xf32>
    %cst_22 = arith.constant 2.000000e-05 : f32
    %47 = vector.broadcast %cst_22 : f32 to vector<8x1xf32>
    %48 = arith.addf %46, %47 : vector<8x1xf32>
    %49 = arith.mulf %18, %24 : vector<8x128xf32>
    %cst_23 = arith.constant dense<0.000000e+00> : vector<8xf32>
    %50 = vector.multi_reduction <add>, %49, %cst_23 [1] : vector<8x128xf32> to vector<8xf32>
    %51 = vector.shape_cast %50 : vector<8xf32> to vector<8x1xf32>
    %cst_24 = arith.constant 7.812500e-03 : f32
    %52 = vector.broadcast %cst_24 : f32 to vector<8x1xf32>
    %53 = arith.mulf %51, %52 : vector<8x1xf32>
    %54 = arith.mulf %24, %24 : vector<8x128xf32>
    %cst_25 = arith.constant dense<0.000000e+00> : vector<8xf32>
    %55 = vector.multi_reduction <add>, %54, %cst_25 [1] : vector<8x128xf32> to vector<8xf32>
    %56 = vector.shape_cast %55 : vector<8xf32> to vector<8x1xf32>
    %cst_26 = arith.constant 7.812500e-03 : f32
    %57 = vector.broadcast %cst_26 : f32 to vector<8x1xf32>
    %58 = arith.mulf %56, %57 : vector<8x1xf32>
    %cst_27 = arith.constant 3.000000e-05 : f32
    %59 = vector.broadcast %cst_27 : f32 to vector<8x1xf32>
    %60 = arith.addf %58, %59 : vector<8x1xf32>
    %61 = arith.addf %31, %48 : vector<8x1xf32>
    %62 = arith.addf %61, %60 : vector<8x1xf32>
    %cst_28 = arith.constant 0.333333343 : f32
    %63 = vector.broadcast %cst_28 : f32 to vector<8x1xf32>
    %64 = arith.mulf %62, %63 : vector<8x1xf32>
    %65 = arith.subf %31, %64 : vector<8x1xf32>
    %66 = arith.subf %48, %64 : vector<8x1xf32>
    %67 = arith.subf %60, %64 : vector<8x1xf32>
    %68 = arith.mulf %65, %65 : vector<8x1xf32>
    %69 = arith.mulf %66, %66 : vector<8x1xf32>
    %70 = arith.addf %68, %69 : vector<8x1xf32>
    %71 = arith.mulf %67, %67 : vector<8x1xf32>
    %72 = arith.addf %70, %71 : vector<8x1xf32>
    %73 = arith.mulf %36, %36 : vector<8x1xf32>
    %74 = arith.mulf %41, %41 : vector<8x1xf32>
    %75 = arith.addf %73, %74 : vector<8x1xf32>
    %76 = arith.mulf %53, %53 : vector<8x1xf32>
    %77 = arith.addf %75, %76 : vector<8x1xf32>
    %cst_29 = arith.constant 2.000000e+00 : f32
    %78 = vector.broadcast %cst_29 : f32 to vector<8x1xf32>
    %79 = arith.mulf %78, %77 : vector<8x1xf32>
    %80 = arith.addf %72, %79 : vector<8x1xf32>
    %cst_30 = arith.constant 0.166666672 : f32
    %81 = vector.broadcast %cst_30 : f32 to vector<8x1xf32>
    %82 = arith.mulf %80, %81 : vector<8x1xf32>
    %83 = math.sqrt %82 : vector<8x1xf32>
    %cst_31 = arith.constant 9.99999968E-21 : f32
    %84 = vector.broadcast %cst_31 : f32 to vector<8x1xf32>
    %85 = arith.cmpf ogt, %83, %84 : vector<8x1xf32>
    %cst_32 = arith.constant 9.99999968E-21 : f32
    %86 = vector.broadcast %cst_32 : f32 to vector<8x1xf32>
    %87 = arith.maximumf %83, %86 : vector<8x1xf32>
    %cst_33 = arith.constant 1.000000e+00 : f32
    %88 = vector.broadcast %cst_33 : f32 to vector<8x1xf32>
    %89 = arith.divf %88, %87 : vector<8x1xf32>
    %cst_34 = arith.constant 0.000000e+00 : f32
    %90 = vector.broadcast %cst_34 : f32 to vector<8x1xf32>
    %91 = arith.select %85, %89, %90 : vector<8x1xi1>, vector<8x1xf32>
    %92 = arith.mulf %65, %91 : vector<8x1xf32>
    %93 = arith.mulf %66, %91 : vector<8x1xf32>
    %94 = arith.mulf %67, %91 : vector<8x1xf32>
    %95 = arith.mulf %36, %91 : vector<8x1xf32>
    %96 = arith.mulf %41, %91 : vector<8x1xf32>
    %97 = arith.mulf %53, %91 : vector<8x1xf32>
    %98 = arith.mulf %93, %94 : vector<8x1xf32>
    %99 = arith.mulf %97, %97 : vector<8x1xf32>
    %100 = arith.subf %98, %99 : vector<8x1xf32>
    %101 = arith.mulf %92, %100 : vector<8x1xf32>
    %102 = arith.mulf %95, %94 : vector<8x1xf32>
    %103 = arith.mulf %97, %96 : vector<8x1xf32>
    %104 = arith.subf %102, %103 : vector<8x1xf32>
    %105 = arith.mulf %95, %104 : vector<8x1xf32>
    %106 = arith.subf %101, %105 : vector<8x1xf32>
    %107 = arith.mulf %95, %97 : vector<8x1xf32>
    %108 = arith.mulf %93, %96 : vector<8x1xf32>
    %109 = arith.subf %107, %108 : vector<8x1xf32>
    %110 = arith.mulf %96, %109 : vector<8x1xf32>
    %111 = arith.addf %106, %110 : vector<8x1xf32>
    %cst_35 = arith.constant 5.000000e-01 : f32
    %112 = vector.broadcast %cst_35 : f32 to vector<8x1xf32>
    %113 = arith.mulf %112, %111 : vector<8x1xf32>
    %cst_36 = arith.constant -1.000000e+00 : f32
    %cst_37 = arith.constant 1.000000e+00 : f32
    %114 = vector.broadcast %cst_36 : f32 to vector<8x1xf32>
    %115 = arith.maximumf %114, %113 : vector<8x1xf32>
    %116 = vector.broadcast %cst_37 : f32 to vector<8x1xf32>
    %117 = arith.minimumf %116, %115 : vector<8x1xf32>
    %cst_38 = arith.constant 1.000000e+00 : f32
    %118 = vector.broadcast %cst_38 : f32 to vector<8x1xf32>
    %119 = arith.addf %118, %117 : vector<8x1xf32>
    %cst_39 = arith.constant 0.000000e+00 : f32
    %120 = vector.broadcast %cst_39 : f32 to vector<8x1xf32>
    %121 = arith.maximumf %119, %120 : vector<8x1xf32>
    %cst_40 = arith.constant 0.166666672 : f32
    %122 = vector.broadcast %cst_40 : f32 to vector<8x1xf32>
    %123 = arith.mulf %121, %122 : vector<8x1xf32>
    %124 = math.sqrt %123 : vector<8x1xf32>
    %cst_41 = arith.constant 5.000000e-01 : f32
    %125 = vector.broadcast %cst_41 : f32 to vector<8x1xf32>
    %126 = arith.addf %125, %124 : vector<8x1xf32>
    %cst_42 = arith.constant -5.000000e-01 : f32
    %127 = vector.broadcast %cst_42 : f32 to vector<8x1xf32>
    %128 = arith.cmpf olt, %117, %127 : vector<8x1xf32>
    %cst_43 = arith.constant 1.000000e+00 : f32
    %129 = vector.broadcast %cst_43 : f32 to vector<8x1xf32>
    %130 = arith.select %128, %126, %129 : vector<8x1xi1>, vector<8x1xf32>
    %131 = arith.mulf %130, %130 : vector<8x1xf32>
    %cst_44 = arith.constant 4.000000e+00 : f32
    %132 = vector.broadcast %cst_44 : f32 to vector<8x1xf32>
    %133 = arith.mulf %132, %131 : vector<8x1xf32>
    %cst_45 = arith.constant 3.000000e+00 : f32
    %134 = vector.broadcast %cst_45 : f32 to vector<8x1xf32>
    %135 = arith.subf %133, %134 : vector<8x1xf32>
    %136 = arith.mulf %130, %135 : vector<8x1xf32>
    %137 = arith.subf %136, %117 : vector<8x1xf32>
    %cst_46 = arith.constant 1.200000e+01 : f32
    %138 = vector.broadcast %cst_46 : f32 to vector<8x1xf32>
    %139 = arith.mulf %138, %131 : vector<8x1xf32>
    %cst_47 = arith.constant 3.000000e+00 : f32
    %140 = vector.broadcast %cst_47 : f32 to vector<8x1xf32>
    %141 = arith.subf %139, %140 : vector<8x1xf32>
    %cst_48 = arith.constant 9.99999997E-7 : f32
    %142 = vector.broadcast %cst_48 : f32 to vector<8x1xf32>
    %143 = arith.maximumf %141, %142 : vector<8x1xf32>
    %144 = arith.divf %137, %143 : vector<8x1xf32>
    %145 = arith.subf %130, %144 : vector<8x1xf32>
    %146 = arith.mulf %145, %145 : vector<8x1xf32>
    %cst_49 = arith.constant 4.000000e+00 : f32
    %147 = vector.broadcast %cst_49 : f32 to vector<8x1xf32>
    %148 = arith.mulf %147, %146 : vector<8x1xf32>
    %cst_50 = arith.constant 3.000000e+00 : f32
    %149 = vector.broadcast %cst_50 : f32 to vector<8x1xf32>
    %150 = arith.subf %148, %149 : vector<8x1xf32>
    %151 = arith.mulf %145, %150 : vector<8x1xf32>
    %152 = arith.subf %151, %117 : vector<8x1xf32>
    %cst_51 = arith.constant 1.200000e+01 : f32
    %153 = vector.broadcast %cst_51 : f32 to vector<8x1xf32>
    %154 = arith.mulf %153, %146 : vector<8x1xf32>
    %cst_52 = arith.constant 3.000000e+00 : f32
    %155 = vector.broadcast %cst_52 : f32 to vector<8x1xf32>
    %156 = arith.subf %154, %155 : vector<8x1xf32>
    %cst_53 = arith.constant 9.99999997E-7 : f32
    %157 = vector.broadcast %cst_53 : f32 to vector<8x1xf32>
    %158 = arith.maximumf %156, %157 : vector<8x1xf32>
    %159 = arith.divf %152, %158 : vector<8x1xf32>
    %160 = arith.subf %145, %159 : vector<8x1xf32>
    %161 = arith.mulf %160, %160 : vector<8x1xf32>
    %cst_54 = arith.constant 4.000000e+00 : f32
    %162 = vector.broadcast %cst_54 : f32 to vector<8x1xf32>
    %163 = arith.mulf %162, %161 : vector<8x1xf32>
    %cst_55 = arith.constant 3.000000e+00 : f32
    %164 = vector.broadcast %cst_55 : f32 to vector<8x1xf32>
    %165 = arith.subf %163, %164 : vector<8x1xf32>
    %166 = arith.mulf %160, %165 : vector<8x1xf32>
    %167 = arith.subf %166, %117 : vector<8x1xf32>
    %cst_56 = arith.constant 1.200000e+01 : f32
    %168 = vector.broadcast %cst_56 : f32 to vector<8x1xf32>
    %169 = arith.mulf %168, %161 : vector<8x1xf32>
    %cst_57 = arith.constant 3.000000e+00 : f32
    %170 = vector.broadcast %cst_57 : f32 to vector<8x1xf32>
    %171 = arith.subf %169, %170 : vector<8x1xf32>
    %cst_58 = arith.constant 9.99999997E-7 : f32
    %172 = vector.broadcast %cst_58 : f32 to vector<8x1xf32>
    %173 = arith.maximumf %171, %172 : vector<8x1xf32>
    %174 = arith.divf %167, %173 : vector<8x1xf32>
    %175 = arith.subf %160, %174 : vector<8x1xf32>
    %176 = arith.mulf %175, %175 : vector<8x1xf32>
    %cst_59 = arith.constant 4.000000e+00 : f32
    %177 = vector.broadcast %cst_59 : f32 to vector<8x1xf32>
    %178 = arith.mulf %177, %176 : vector<8x1xf32>
    %cst_60 = arith.constant 3.000000e+00 : f32
    %179 = vector.broadcast %cst_60 : f32 to vector<8x1xf32>
    %180 = arith.subf %178, %179 : vector<8x1xf32>
    %181 = arith.mulf %175, %180 : vector<8x1xf32>
    %182 = arith.subf %181, %117 : vector<8x1xf32>
    %cst_61 = arith.constant 1.200000e+01 : f32
    %183 = vector.broadcast %cst_61 : f32 to vector<8x1xf32>
    %184 = arith.mulf %183, %176 : vector<8x1xf32>
    %cst_62 = arith.constant 3.000000e+00 : f32
    %185 = vector.broadcast %cst_62 : f32 to vector<8x1xf32>
    %186 = arith.subf %184, %185 : vector<8x1xf32>
    %cst_63 = arith.constant 9.99999997E-7 : f32
    %187 = vector.broadcast %cst_63 : f32 to vector<8x1xf32>
    %188 = arith.maximumf %186, %187 : vector<8x1xf32>
    %189 = arith.divf %182, %188 : vector<8x1xf32>
    %190 = arith.subf %175, %189 : vector<8x1xf32>
    %191 = arith.mulf %190, %190 : vector<8x1xf32>
    %cst_64 = arith.constant 4.000000e+00 : f32
    %192 = vector.broadcast %cst_64 : f32 to vector<8x1xf32>
    %193 = arith.mulf %192, %191 : vector<8x1xf32>
    %cst_65 = arith.constant 3.000000e+00 : f32
    %194 = vector.broadcast %cst_65 : f32 to vector<8x1xf32>
    %195 = arith.subf %193, %194 : vector<8x1xf32>
    %196 = arith.mulf %190, %195 : vector<8x1xf32>
    %197 = arith.subf %196, %117 : vector<8x1xf32>
    %cst_66 = arith.constant 1.200000e+01 : f32
    %198 = vector.broadcast %cst_66 : f32 to vector<8x1xf32>
    %199 = arith.mulf %198, %191 : vector<8x1xf32>
    %cst_67 = arith.constant 3.000000e+00 : f32
    %200 = vector.broadcast %cst_67 : f32 to vector<8x1xf32>
    %201 = arith.subf %199, %200 : vector<8x1xf32>
    %cst_68 = arith.constant 9.99999997E-7 : f32
    %202 = vector.broadcast %cst_68 : f32 to vector<8x1xf32>
    %203 = arith.maximumf %201, %202 : vector<8x1xf32>
    %204 = arith.divf %197, %203 : vector<8x1xf32>
    %205 = arith.subf %190, %204 : vector<8x1xf32>
    %206 = arith.mulf %205, %205 : vector<8x1xf32>
    %cst_69 = arith.constant 4.000000e+00 : f32
    %207 = vector.broadcast %cst_69 : f32 to vector<8x1xf32>
    %208 = arith.mulf %207, %206 : vector<8x1xf32>
    %cst_70 = arith.constant 3.000000e+00 : f32
    %209 = vector.broadcast %cst_70 : f32 to vector<8x1xf32>
    %210 = arith.subf %208, %209 : vector<8x1xf32>
    %211 = arith.mulf %205, %210 : vector<8x1xf32>
    %212 = arith.subf %211, %117 : vector<8x1xf32>
    %cst_71 = arith.constant 1.200000e+01 : f32
    %213 = vector.broadcast %cst_71 : f32 to vector<8x1xf32>
    %214 = arith.mulf %213, %206 : vector<8x1xf32>
    %cst_72 = arith.constant 3.000000e+00 : f32
    %215 = vector.broadcast %cst_72 : f32 to vector<8x1xf32>
    %216 = arith.subf %214, %215 : vector<8x1xf32>
    %cst_73 = arith.constant 9.99999997E-7 : f32
    %217 = vector.broadcast %cst_73 : f32 to vector<8x1xf32>
    %218 = arith.maximumf %216, %217 : vector<8x1xf32>
    %219 = arith.divf %212, %218 : vector<8x1xf32>
    %220 = arith.subf %205, %219 : vector<8x1xf32>
    %221 = arith.mulf %220, %220 : vector<8x1xf32>
    %cst_74 = arith.constant 4.000000e+00 : f32
    %222 = vector.broadcast %cst_74 : f32 to vector<8x1xf32>
    %223 = arith.mulf %222, %221 : vector<8x1xf32>
    %cst_75 = arith.constant 3.000000e+00 : f32
    %224 = vector.broadcast %cst_75 : f32 to vector<8x1xf32>
    %225 = arith.subf %223, %224 : vector<8x1xf32>
    %226 = arith.mulf %220, %225 : vector<8x1xf32>
    %227 = arith.subf %226, %117 : vector<8x1xf32>
    %cst_76 = arith.constant 1.200000e+01 : f32
    %228 = vector.broadcast %cst_76 : f32 to vector<8x1xf32>
    %229 = arith.mulf %228, %221 : vector<8x1xf32>
    %cst_77 = arith.constant 3.000000e+00 : f32
    %230 = vector.broadcast %cst_77 : f32 to vector<8x1xf32>
    %231 = arith.subf %229, %230 : vector<8x1xf32>
    %cst_78 = arith.constant 9.99999997E-7 : f32
    %232 = vector.broadcast %cst_78 : f32 to vector<8x1xf32>
    %233 = arith.maximumf %231, %232 : vector<8x1xf32>
    %234 = arith.divf %227, %233 : vector<8x1xf32>
    %235 = arith.subf %220, %234 : vector<8x1xf32>
    %cst_79 = arith.constant 5.000000e-01 : f32
    %cst_80 = arith.constant 1.000000e+00 : f32
    %236 = vector.broadcast %cst_79 : f32 to vector<8x1xf32>
    %237 = arith.maximumf %236, %235 : vector<8x1xf32>
    %238 = vector.broadcast %cst_80 : f32 to vector<8x1xf32>
    %239 = arith.minimumf %238, %237 : vector<8x1xf32>
    %240 = arith.mulf %239, %239 : vector<8x1xf32>
    %cst_81 = arith.constant 1.000000e+00 : f32
    %241 = vector.broadcast %cst_81 : f32 to vector<8x1xf32>
    %242 = arith.subf %241, %240 : vector<8x1xf32>
    %cst_82 = arith.constant 0.000000e+00 : f32
    %243 = vector.broadcast %cst_82 : f32 to vector<8x1xf32>
    %244 = arith.maximumf %242, %243 : vector<8x1xf32>
    %245 = math.sqrt %244 : vector<8x1xf32>
    %cst_83 = arith.constant 2.000000e+00 : f32
    %246 = vector.broadcast %cst_83 : f32 to vector<8x1xf32>
    %247 = arith.mulf %246, %83 : vector<8x1xf32>
    %248 = arith.mulf %247, %239 : vector<8x1xf32>
    %249 = arith.addf %64, %248 : vector<8x1xf32>
    %cst_84 = arith.constant 1.73205078 : f32
    %250 = vector.broadcast %cst_84 : f32 to vector<8x1xf32>
    %251 = arith.mulf %250, %245 : vector<8x1xf32>
    %252 = arith.addf %239, %251 : vector<8x1xf32>
    %253 = arith.mulf %83, %252 : vector<8x1xf32>
    %254 = arith.subf %64, %253 : vector<8x1xf32>
    %cst_85 = arith.constant 3.000000e+00 : f32
    %255 = vector.broadcast %cst_85 : f32 to vector<8x1xf32>
    %256 = arith.mulf %255, %64 : vector<8x1xf32>
    %257 = arith.subf %256, %249 : vector<8x1xf32>
    %258 = arith.subf %257, %254 : vector<8x1xf32>
    %cst_86 = arith.constant 9.99999974E-6 : f32
    %259 = vector.broadcast %cst_86 : f32 to vector<8x1xf32>
    %260 = arith.addf %249, %259 : vector<8x1xf32>
    %cst_87 = arith.constant 9.99999968E-21 : f32
    %261 = vector.broadcast %cst_87 : f32 to vector<8x1xf32>
    %262 = arith.maximumf %260, %261 : vector<8x1xf32>
    %263 = math.rsqrt %262 : vector<8x1xf32>
    %cst_88 = arith.constant 9.99999974E-6 : f32
    %264 = vector.broadcast %cst_88 : f32 to vector<8x1xf32>
    %265 = arith.addf %258, %264 : vector<8x1xf32>
    %cst_89 = arith.constant 9.99999968E-21 : f32
    %266 = vector.broadcast %cst_89 : f32 to vector<8x1xf32>
    %267 = arith.maximumf %265, %266 : vector<8x1xf32>
    %268 = math.rsqrt %267 : vector<8x1xf32>
    %cst_90 = arith.constant 9.99999974E-6 : f32
    %269 = vector.broadcast %cst_90 : f32 to vector<8x1xf32>
    %270 = arith.addf %254, %269 : vector<8x1xf32>
    %cst_91 = arith.constant 9.99999968E-21 : f32
    %271 = vector.broadcast %cst_91 : f32 to vector<8x1xf32>
    %272 = arith.maximumf %270, %271 : vector<8x1xf32>
    %273 = math.rsqrt %272 : vector<8x1xf32>
    %274 = arith.subf %249, %258 : vector<8x1xf32>
    %275 = arith.subf %258, %254 : vector<8x1xf32>
    %276 = arith.subf %249, %254 : vector<8x1xf32>
    %277 = math.absf %249 : vector<8x1xf32>
    %278 = math.absf %258 : vector<8x1xf32>
    %279 = arith.addf %277, %278 : vector<8x1xf32>
    %cst_92 = arith.constant 2.000000e-05 : f32
    %280 = vector.broadcast %cst_92 : f32 to vector<8x1xf32>
    %281 = arith.addf %279, %280 : vector<8x1xf32>
    %cst_93 = arith.constant 4.000000e-04 : f32
    %282 = vector.broadcast %cst_93 : f32 to vector<8x1xf32>
    %283 = arith.mulf %282, %281 : vector<8x1xf32>
    %284 = math.absf %258 : vector<8x1xf32>
    %285 = math.absf %254 : vector<8x1xf32>
    %286 = arith.addf %284, %285 : vector<8x1xf32>
    %cst_94 = arith.constant 2.000000e-05 : f32
    %287 = vector.broadcast %cst_94 : f32 to vector<8x1xf32>
    %288 = arith.addf %286, %287 : vector<8x1xf32>
    %cst_95 = arith.constant 4.000000e-04 : f32
    %289 = vector.broadcast %cst_95 : f32 to vector<8x1xf32>
    %290 = arith.mulf %289, %288 : vector<8x1xf32>
    %291 = math.absf %249 : vector<8x1xf32>
    %292 = math.absf %254 : vector<8x1xf32>
    %293 = arith.addf %291, %292 : vector<8x1xf32>
    %cst_96 = arith.constant 2.000000e-05 : f32
    %294 = vector.broadcast %cst_96 : f32 to vector<8x1xf32>
    %295 = arith.addf %293, %294 : vector<8x1xf32>
    %cst_97 = arith.constant 4.000000e-04 : f32
    %296 = vector.broadcast %cst_97 : f32 to vector<8x1xf32>
    %297 = arith.mulf %296, %295 : vector<8x1xf32>
    %298 = arith.addf %249, %258 : vector<8x1xf32>
    %cst_98 = arith.constant 5.000000e-01 : f32
    %299 = vector.broadcast %cst_98 : f32 to vector<8x1xf32>
    %300 = arith.mulf %299, %298 : vector<8x1xf32>
    %cst_99 = arith.constant 9.99999974E-6 : f32
    %301 = vector.broadcast %cst_99 : f32 to vector<8x1xf32>
    %302 = arith.addf %300, %301 : vector<8x1xf32>
    %cst_100 = arith.constant 9.99999968E-21 : f32
    %303 = vector.broadcast %cst_100 : f32 to vector<8x1xf32>
    %304 = arith.maximumf %302, %303 : vector<8x1xf32>
    %305 = math.rsqrt %304 : vector<8x1xf32>
    %306 = arith.addf %258, %254 : vector<8x1xf32>
    %cst_101 = arith.constant 5.000000e-01 : f32
    %307 = vector.broadcast %cst_101 : f32 to vector<8x1xf32>
    %308 = arith.mulf %307, %306 : vector<8x1xf32>
    %cst_102 = arith.constant 9.99999974E-6 : f32
    %309 = vector.broadcast %cst_102 : f32 to vector<8x1xf32>
    %310 = arith.addf %308, %309 : vector<8x1xf32>
    %cst_103 = arith.constant 9.99999968E-21 : f32
    %311 = vector.broadcast %cst_103 : f32 to vector<8x1xf32>
    %312 = arith.maximumf %310, %311 : vector<8x1xf32>
    %313 = math.rsqrt %312 : vector<8x1xf32>
    %314 = arith.cmpf ogt, %274, %283 : vector<8x1xf32>
    %315 = arith.subf %263, %268 : vector<8x1xf32>
    %cst_104 = arith.constant 1.000000e-30 : f32
    %316 = vector.broadcast %cst_104 : f32 to vector<8x1xf32>
    %317 = arith.maximumf %274, %316 : vector<8x1xf32>
    %318 = arith.divf %315, %317 : vector<8x1xf32>
    %cst_105 = arith.constant -5.000000e-01 : f32
    %319 = vector.broadcast %cst_105 : f32 to vector<8x1xf32>
    %320 = arith.mulf %319, %305 : vector<8x1xf32>
    %321 = arith.mulf %320, %305 : vector<8x1xf32>
    %322 = arith.mulf %321, %305 : vector<8x1xf32>
    %323 = arith.select %314, %318, %322 : vector<8x1xi1>, vector<8x1xf32>
    %324 = arith.cmpf ogt, %275, %290 : vector<8x1xf32>
    %325 = arith.subf %268, %273 : vector<8x1xf32>
    %cst_106 = arith.constant 1.000000e-30 : f32
    %326 = vector.broadcast %cst_106 : f32 to vector<8x1xf32>
    %327 = arith.maximumf %275, %326 : vector<8x1xf32>
    %328 = arith.divf %325, %327 : vector<8x1xf32>
    %cst_107 = arith.constant -5.000000e-01 : f32
    %329 = vector.broadcast %cst_107 : f32 to vector<8x1xf32>
    %330 = arith.mulf %329, %313 : vector<8x1xf32>
    %331 = arith.mulf %330, %313 : vector<8x1xf32>
    %332 = arith.mulf %331, %313 : vector<8x1xf32>
    %333 = arith.select %324, %328, %332 : vector<8x1xi1>, vector<8x1xf32>
    %334 = arith.mulf %268, %268 : vector<8x1xf32>
    %335 = arith.cmpf ogt, %276, %297 : vector<8x1xf32>
    %336 = arith.subf %323, %333 : vector<8x1xf32>
    %cst_108 = arith.constant 1.000000e-30 : f32
    %337 = vector.broadcast %cst_108 : f32 to vector<8x1xf32>
    %338 = arith.maximumf %276, %337 : vector<8x1xf32>
    %339 = arith.divf %336, %338 : vector<8x1xf32>
    %cst_109 = arith.constant 3.750000e-01 : f32
    %340 = vector.broadcast %cst_109 : f32 to vector<8x1xf32>
    %341 = arith.mulf %340, %334 : vector<8x1xf32>
    %342 = arith.mulf %341, %334 : vector<8x1xf32>
    %343 = arith.mulf %342, %268 : vector<8x1xf32>
    %344 = arith.select %335, %339, %343 : vector<8x1xi1>, vector<8x1xf32>
    %345 = vector.broadcast %31 : vector<8x1xf32> to vector<8x128xf32>
    %346 = arith.mulf %345, %12 : vector<8x128xf32>
    %347 = vector.broadcast %36 : vector<8x1xf32> to vector<8x128xf32>
    %348 = arith.mulf %347, %18 : vector<8x128xf32>
    %349 = arith.addf %346, %348 : vector<8x128xf32>
    %350 = vector.broadcast %41 : vector<8x1xf32> to vector<8x128xf32>
    %351 = arith.mulf %350, %24 : vector<8x128xf32>
    %352 = arith.addf %349, %351 : vector<8x128xf32>
    %353 = vector.broadcast %258 : vector<8x1xf32> to vector<8x128xf32>
    %354 = arith.mulf %353, %12 : vector<8x128xf32>
    %355 = arith.subf %352, %354 : vector<8x128xf32>
    %356 = vector.broadcast %36 : vector<8x1xf32> to vector<8x128xf32>
    %357 = arith.mulf %356, %12 : vector<8x128xf32>
    %358 = vector.broadcast %48 : vector<8x1xf32> to vector<8x128xf32>
    %359 = arith.mulf %358, %18 : vector<8x128xf32>
    %360 = arith.addf %357, %359 : vector<8x128xf32>
    %361 = vector.broadcast %53 : vector<8x1xf32> to vector<8x128xf32>
    %362 = arith.mulf %361, %24 : vector<8x128xf32>
    %363 = arith.addf %360, %362 : vector<8x128xf32>
    %364 = vector.broadcast %258 : vector<8x1xf32> to vector<8x128xf32>
    %365 = arith.mulf %364, %18 : vector<8x128xf32>
    %366 = arith.subf %363, %365 : vector<8x128xf32>
    %367 = vector.broadcast %41 : vector<8x1xf32> to vector<8x128xf32>
    %368 = arith.mulf %367, %12 : vector<8x128xf32>
    %369 = vector.broadcast %53 : vector<8x1xf32> to vector<8x128xf32>
    %370 = arith.mulf %369, %18 : vector<8x128xf32>
    %371 = arith.addf %368, %370 : vector<8x128xf32>
    %372 = vector.broadcast %60 : vector<8x1xf32> to vector<8x128xf32>
    %373 = arith.mulf %372, %24 : vector<8x128xf32>
    %374 = arith.addf %371, %373 : vector<8x128xf32>
    %375 = vector.broadcast %258 : vector<8x1xf32> to vector<8x128xf32>
    %376 = arith.mulf %375, %24 : vector<8x128xf32>
    %377 = arith.subf %374, %376 : vector<8x128xf32>
    %378 = vector.broadcast %323 : vector<8x1xf32> to vector<8x128xf32>
    %379 = arith.mulf %378, %12 : vector<8x128xf32>
    %380 = vector.broadcast %344 : vector<8x1xf32> to vector<8x128xf32>
    %381 = arith.mulf %380, %355 : vector<8x128xf32>
    %382 = arith.addf %379, %381 : vector<8x128xf32>
    %383 = vector.broadcast %323 : vector<8x1xf32> to vector<8x128xf32>
    %384 = arith.mulf %383, %18 : vector<8x128xf32>
    %385 = vector.broadcast %344 : vector<8x1xf32> to vector<8x128xf32>
    %386 = arith.mulf %385, %366 : vector<8x128xf32>
    %387 = arith.addf %384, %386 : vector<8x128xf32>
    %388 = vector.broadcast %323 : vector<8x1xf32> to vector<8x128xf32>
    %389 = arith.mulf %388, %24 : vector<8x128xf32>
    %390 = vector.broadcast %344 : vector<8x1xf32> to vector<8x128xf32>
    %391 = arith.mulf %390, %377 : vector<8x128xf32>
    %392 = arith.addf %389, %391 : vector<8x128xf32>
    %393 = vector.broadcast %31 : vector<8x1xf32> to vector<8x128xf32>
    %394 = arith.mulf %393, %382 : vector<8x128xf32>
    %395 = vector.broadcast %36 : vector<8x1xf32> to vector<8x128xf32>
    %396 = arith.mulf %395, %387 : vector<8x128xf32>
    %397 = arith.addf %394, %396 : vector<8x128xf32>
    %398 = vector.broadcast %41 : vector<8x1xf32> to vector<8x128xf32>
    %399 = arith.mulf %398, %392 : vector<8x128xf32>
    %400 = arith.addf %397, %399 : vector<8x128xf32>
    %401 = vector.broadcast %249 : vector<8x1xf32> to vector<8x128xf32>
    %402 = arith.mulf %401, %382 : vector<8x128xf32>
    %403 = arith.subf %400, %402 : vector<8x128xf32>
    %404 = vector.broadcast %36 : vector<8x1xf32> to vector<8x128xf32>
    %405 = arith.mulf %404, %382 : vector<8x128xf32>
    %406 = vector.broadcast %48 : vector<8x1xf32> to vector<8x128xf32>
    %407 = arith.mulf %406, %387 : vector<8x128xf32>
    %408 = arith.addf %405, %407 : vector<8x128xf32>
    %409 = vector.broadcast %53 : vector<8x1xf32> to vector<8x128xf32>
    %410 = arith.mulf %409, %392 : vector<8x128xf32>
    %411 = arith.addf %408, %410 : vector<8x128xf32>
    %412 = vector.broadcast %249 : vector<8x1xf32> to vector<8x128xf32>
    %413 = arith.mulf %412, %387 : vector<8x128xf32>
    %414 = arith.subf %411, %413 : vector<8x128xf32>
    %415 = vector.broadcast %41 : vector<8x1xf32> to vector<8x128xf32>
    %416 = arith.mulf %415, %382 : vector<8x128xf32>
    %417 = vector.broadcast %53 : vector<8x1xf32> to vector<8x128xf32>
    %418 = arith.mulf %417, %387 : vector<8x128xf32>
    %419 = arith.addf %416, %418 : vector<8x128xf32>
    %420 = vector.broadcast %60 : vector<8x1xf32> to vector<8x128xf32>
    %421 = arith.mulf %420, %392 : vector<8x128xf32>
    %422 = arith.addf %419, %421 : vector<8x128xf32>
    %423 = vector.broadcast %249 : vector<8x1xf32> to vector<8x128xf32>
    %424 = arith.mulf %423, %392 : vector<8x128xf32>
    %425 = arith.subf %422, %424 : vector<8x128xf32>
    %426 = vector.broadcast %263 : vector<8x1xf32> to vector<8x128xf32>
    %427 = arith.mulf %426, %12 : vector<8x128xf32>
    %428 = arith.addf %427, %403 : vector<8x128xf32>
    %429 = vector.broadcast %0 : vector<1x128xf32> to vector<8x128xf32>
    %430 = arith.mulf %428, %429 : vector<8x128xf32>
    %431 = vector.broadcast %263 : vector<8x1xf32> to vector<8x128xf32>
    %432 = arith.mulf %431, %18 : vector<8x128xf32>
    %433 = arith.addf %432, %414 : vector<8x128xf32>
    %434 = vector.broadcast %0 : vector<1x128xf32> to vector<8x128xf32>
    %435 = arith.mulf %433, %434 : vector<8x128xf32>
    %436 = vector.broadcast %263 : vector<8x1xf32> to vector<8x128xf32>
    %437 = arith.mulf %436, %24 : vector<8x128xf32>
    %438 = arith.addf %437, %425 : vector<8x128xf32>
    %439 = vector.broadcast %0 : vector<1x128xf32> to vector<8x128xf32>
    %440 = arith.mulf %438, %439 : vector<8x128xf32>
    %441 = vector.shape_cast %430 : vector<8x128xf32> to vector<8x1x128xf32>
    %442 = vector.shape_cast %435 : vector<8x128xf32> to vector<8x1x128xf32>
    %443 = vector.shape_cast %440 : vector<8x128xf32> to vector<8x1x128xf32>
    %444 = tpu.concatenate %441, %442, %443 in 1 : vector<8x1x128xf32>, vector<8x1x128xf32>, vector<8x1x128xf32> -> vector<8x3x128xf32>
    %c0_110 = arith.constant 0 : index
    %c0_111 = arith.constant 0 : index
    %c0_112 = arith.constant 0 : index
    %445 = vector.load %arg3[%c0_110, %c0_111, %c0_112] : memref<8x3x128xf32, #tpu.memory_space<vmem>>, vector<8x3x128xf32>
    tpu.vector_store %arg3[%c0_110, %c0_111, %c0_112], %444 {strides = array<i32>} : memref<8x3x128xf32, #tpu.memory_space<vmem>>, vector<8x3x128xf32>,
    return
  }
  func.func @transform_0(%arg0: i32) -> (i32, i32, i32) {
    %c0_i32 = arith.constant 0 : i32
    %c0_i32_0 = arith.constant 0 : i32
    %c0_i32_1 = arith.constant 0 : i32
    return %arg0, %c0_i32, %c0_i32_0 : i32, i32, i32
  }
  func.func @transform_1(%arg0: i32) -> (i32, i32) {
    %c0_i32 = arith.constant 0 : i32
    %c0_i32_0 = arith.constant 0 : i32
    %c0_i32_1 = arith.constant 0 : i32
    return %c0_i32, %c0_i32_0 : i32, i32
  }
  func.func @transform_2(%arg0: i32) -> (i32, i32, i32) {
    %c0_i32 = arith.constant 0 : i32
    %c0_i32_0 = arith.constant 0 : i32
    %c0_i32_1 = arith.constant 0 : i32
    return %arg0, %c0_i32, %c0_i32_0 : i32, i32, i32
  }
}

</mosaic_0001>

<bundles_post_ra>
// kernel: tpu_custom_call.1
= control target key start
LH: loop header
LB: loop body
LE: loop exit
PB: predicated region body
PF: predicated region fallthrough
CT: control target
= control target key end

     0   :  { %s1318_s9 = smov 0   ;;  %s1931_s0 = inlined_call_operand.vmem [shape: f32[16,3,128], index: 0, kind: input, shape index: {}]   ;;  %s1932_s1 = inlined_call_operand.vmem [shape: f32[1,128], index: 1, kind: input, shape index: {}]   ;;  %s1933_s2 = inlined_call_operand.vmem [shape: f32[16,3,128], index: 2, kind: output, shape index: {}]  }
   0x1 LB: > { %s1220_s10 = sadd.s32 4294967295, %s1300_s9   ;;  %p1224_p0 = scmp.ge.s32.totalorder %s1300_s9, 1  ;;  %s1300_s9 = sphi %s1318_s9, %s12_s9  }
   0x2   : > { %p113_p1 = scmp.lt.s32.totalorder %s1300_s9, 3 }
   0x4   : > { %p114_p2 = pnand %p1224_p0, %p113_p1 }
   0x5   : > { %s1225_s11 = sshll.u32 (!%p114_p2), %s1220_s10, 3  ;;  %vm181_vm0 = vcmask (!%p114_p2), 1041409   ;;  %vm184_vm1 = vcmask (!%p114_p2), 1042434   ;;  %vm187_vm2 = vcmask (!%p114_p2), 1043459   ;;  %vm190_vm3 = vcmask (!%p114_p2), 1044484  }
   0x6   : > { %117 = sbr.rel (%p114_p2) target bundleno = 714 (0x2ca), region = 28  ;;  %p136_p3 = scmp.lt.s32.totalorder (!%p114_p2), %s1225_s11, 15  ;;  %vm193_vm4 = vcmask (!%p114_p2), 1045509   ;;  %vm196_vm5 = vcmask (!%p114_p2), 1046534   ;;  %vm199_vm6 = vcmask (!%p114_p2), 1047559  }
   0xd   : > { %s1942_s11 = smov (!%p136_p3, %s1225_s11), 15 }
   0xe   : > { %s1226_s12 = sshll.u32 %s1942_s11, 2 }
   0xf   : > { %s1334_s15 = scalar_lea.vmem %s1931_s0, %s1226_s12  ;;  %s145_s20 = scalar_lea.vmem %s1933_s2, %s1226_s12 }
  0x10   : > { %v1337_v0 = vld [vmem:[%s1334_s15 + $0x2] sm:$0x1]  ;;  %v1340_v1 = vld [vmem:[%s1334_s15 + $0x6] sm:$0x1]  ;;  %v1343_v2 = vld [vmem:[%s1334_s15 + $0xa] sm:$0x1] }
  0x11   : > { %v1346_v3 = vld [vmem:[%s1334_s15 + $0xe] sm:$0x1]  ;;  %v1349_v4 = vld [vmem:[%s1334_s15 + $0x12] sm:$0x1]  ;;  %v1352_v5 = vld [vmem:[%s1334_s15 + $0x16] sm:$0x1] }
  0x12   : > { %v1355_v6 = vld [vmem:[%s1334_s15 + $0x1a] sm:$0x1]  ;;  %v1358_v7 = vld [vmem:[%s1334_s15 + $0x1e] sm:$0x1]  ;;  %v288_v8 = vrot.slane %v1340_v1, 7  ;;  %v290_v9 = vrot.slane %v1343_v2, 6 }
  0x13   : > { %v292_v10 = vrot.slane %v1346_v3, 5  ;;  %v294_v11 = vrot.slane %v1349_v4, 4  ;;  %v296_v12 = vrot.slane %v1352_v5, 3  ;;  %v1366_v13 = vld [vmem:[%s1334_s15] sm:$0x1]  ;;  %v298_v15 = vrot.slane %v1355_v6, 2 }
  0x14   : > { %v289_v14 = vsel %vm181_vm0, %v288_v8, %v1337_v0  ;;  %v300_v16 = vrot.slane %v1358_v7, 1  ;;  %v1373_v17 = vld [vmem:[%s1334_s15 + $0x4] sm:$0x1]  ;;  %v1376_v18 = vld [vmem:[%s1334_s15 + $0x8] sm:$0x1] }
  0x15   : > { %v291_v19 = vsel %vm184_vm1, %v290_v9, %v289_v14  ;;  %v1380_v20 = vld [vmem:[%s1334_s15 + $0xc] sm:$0x1]  ;;  %v1383_v21 = vld [vmem:[%s1334_s15 + $0x10] sm:$0x1]  ;;  %v1386_v22 = vld [vmem:[%s1334_s15 + $0x14] sm:$0x1] }
  0x16   : > { %v293_v23 = vsel %vm187_vm2, %v292_v10, %v291_v19  ;;  %v1390_v24 = vld [vmem:[%s1334_s15 + $0x18] sm:$0x1]  ;;  %v1393_v25 = vld [vmem:[%s1334_s15 + $0x1c] sm:$0x1]  ;;  %v180_v26 = vrot.slane %v1373_v17, 7  ;;  %v183_v27 = vrot.slane %v1376_v18, 6 }
  0x17   : > { %v295_v28 = vsel %vm190_vm3, %v294_v11, %v293_v23  ;;  %v186_v29 = vrot.slane %v1380_v20, 5  ;;  %v189_v30 = vrot.slane %v1383_v21, 4  ;;  %v192_v31 = vrot.slane %v1386_v22, 3  ;;  %v1402_v32 = vld [vmem:[%s1334_s15 + $0x1] sm:$0x1] }
  0x18   : > { %v297_v33 = vsel %vm193_vm4, %v296_v12, %v295_v28  ;;  %v182_v34 = vsel %vm181_vm0, %v180_v26, %v1366_v13  ;;  %v195_v35 = vrot.slane %v1390_v24, 2  ;;  %v198_v36 = vrot.slane %v1393_v25, 1  ;;  %v1410_v37 = vld [vmem:[%s1334_s15 + $0x5] sm:$0x1]  ;;  %v1413_v38 = vld [vmem:[%s1334_s15 + $0x9] sm:$0x1] }
  0x19   : > { %v299_v39 = vsel %vm196_vm5, %v298_v15, %v297_v33  ;;  %v185_v40 = vsel %vm184_vm1, %v183_v27, %v182_v34  ;;  %v1418_v41 = vld [vmem:[%s1334_s15 + $0xd] sm:$0x1]  ;;  %v1421_v42 = vld [vmem:[%s1334_s15 + $0x11] sm:$0x1]  ;;  %v1424_v43 = vld [vmem:[%s1334_s15 + $0x15] sm:$0x1] }
  0x1a   : > { %v301_v44 = vsel %vm199_vm6, %v300_v16, %v299_v39  ;;  %v188_v45 = vsel %vm187_vm2, %v186_v29, %v185_v40  ;;  %v1429_v46 = vld [vmem:[%s1334_s15 + $0x19] sm:$0x1]  ;;  %v238_v47 = vrot.slane %v1410_v37, 7  ;;  %v240_v48 = vrot.slane %v1413_v38, 6  ;;  %v1435_v50 = vld [vmem:[%s1334_s15 + $0x1d] sm:$0x1] }
  0x1b   : > { %303 = vadd.xlane.f32.xlu1 %v301_v44  ;;  %v191_v49 = vsel %vm190_vm3, %v189_v30, %v188_v45  ;;  %v242_v51 = vrot.slane %v1418_v41, 5  ;;  %v244_v52 = vrot.slane %v1421_v42, 4  ;;  %v246_v55 = vrot.slane %v1424_v43, 3 }
  0x1c   : > { %v194_v53 = vsel %vm193_vm4, %v192_v31, %v191_v49  ;;  %v239_v54 = vsel %vm181_vm0, %v238_v47, %v1402_v32  ;;  %v248_v58 = vrot.slane %v1429_v46, 2  ;;  %v250_v61 = vrot.slane %v1435_v50, 1 }
  0x1d   : > { %v197_v56 = vsel %vm196_vm5, %v195_v35, %v194_v53  ;;  %v241_v57 = vsel %vm184_vm1, %v240_v48, %v239_v54 }
  0x1e   : > { %v200_v59 = vsel %vm199_vm6, %v198_v36, %v197_v56  ;;  %v243_v60 = vsel %vm187_vm2, %v242_v51, %v241_v57 }
  0x1f   : > { %202 = vadd.xlane.f32.xlu0 %v200_v59  ;;  %v245_v62 = vsel %vm190_vm3, %v244_v52, %v243_v60 }
  0x20   : > { %v247_v63 = vsel %vm193_vm4, %v246_v55, %v245_v62 }
  0x21   : > { %v249_v8 = vsel %vm196_vm5, %v248_v58, %v247_v63 }
  0x22   : > { %v251_v9 = vsel %vm199_vm6, %v250_v61, %v249_v8 }
  0x23   : > { %253 = vadd.xlane.f32.xlu0 %v251_v9 }
  0xa8   : > { %v304_v10 = vpop.xlane.xlu1 %303 }
  0xa9   : > { %v305_v11 = vmul.f32 0.0078125, %v304_v10 }
  0xab   : > { %v307_v12 = vrot.slane %v305_v11, 1  ;;  %v308_v14 = vrot.slane %v305_v11, 2  ;;  %v309_v15 = vrot.slane %v305_v11, 3  ;;  %v310_v16 = vrot.slane %v305_v11, 4 }
  0xac   : > { %v203_v19 = vpop.xlane.xlu0 %202  ;;  %v311_v23 = vrot.slane %v305_v11, 5  ;;  %v312_v26 = vrot.slane %v305_v11, 6  ;;  %v313_v27 = vrot.slane %v305_v11, 7  ;;  %v1454_v28 = vsub.f32 %v1337_v0, %v305_v11 }
  0xad   : > { %v205_v29 = vmul.f32 0.0078125, %v203_v19  ;;  %v1457_v30 = vsub.f32 %v1340_v1, %v307_v12  ;;  %v1460_v31 = vsub.f32 %v1343_v2, %v308_v14  ;;  %v1463_v33 = vsub.f32 %v1346_v3, %v309_v15 }
  0xae   : > { %v1466_v34 = vsub.f32 %v1349_v4, %v310_v16  ;;  %v1469_v35 = vsub.f32 %v1352_v5, %v311_v23  ;;  %v1472_v36 = vsub.f32 %v1355_v6, %v312_v26  ;;  %v1475_v0 = vsub.f32 %v1358_v7, %v313_v27 }
  0xaf   : > { %v207_v1 = vrot.slane %v205_v29, 1  ;;  %v208_v39 = vrot.slane %v205_v29, 2  ;;  %v209_v40 = vrot.slane %v205_v29, 3  ;;  %v210_v2 = vrot.slane %v205_v29, 4 }
  0xb0   : > { %v254_v44 = vpop.xlane.xlu0 %253  ;;  %v211_v45 = vrot.slane %v205_v29, 5  ;;  %v212_v3 = vrot.slane %v205_v29, 6  ;;  %v213_v47 = vrot.slane %v205_v29, 7  ;;  %v1478_v4 = vsub.f32 %v1366_v13, %v205_v29 }
  0xb1   : > { %v1480_v48 = vmul.f32 0.0078125, %v254_v44  ;;  %v1483_v5 = vsub.f32 %v1373_v17, %v207_v1  ;;  %v1486_v6 = vsub.f32 %v1376_v18, %v208_v39  ;;  %v1489_v7 = vsub.f32 %v1380_v20, %v209_v40 }
  0xb2   : > { %v1492_v49 = vsub.f32 %v1383_v21, %v210_v2  ;;  %v1495_v51 = vsub.f32 %v1386_v22, %v211_v45  ;;  %v1498_v13 = vsub.f32 %v1390_v24, %v212_v3  ;;  %v1501_v52 = vsub.f32 %v1393_v25, %v213_v47 }
  0xb3   : > { %v330_v17 = vmul.f32 %v1478_v4, %v1478_v4  ;;  %v331_v18 = vmul.f32 %v1483_v5, %v1483_v5  ;;  %v332_v20 = vmul.f32 %v1486_v6, %v1486_v6  ;;  %v333_v21 = vmul.f32 %v1489_v7, %v1489_v7 }
  0xb4   : > { %v334_v22 = vmul.f32 %v1492_v49, %v1492_v49  ;;  %v335_v24 = vmul.f32 %v1495_v51, %v1495_v51  ;;  %v336_v25 = vmul.f32 %v1498_v13, %v1498_v13  ;;  %v337_v53 = vmul.f32 %v1501_v52, %v1501_v52 }
  0xb5   : > { %v346_v54 = vrot.slane %v331_v18, 7  ;;  %v348_v55 = vrot.slane %v332_v20, 6  ;;  %v350_v56 = vrot.slane %v333_v21, 5  ;;  %v773_v57 = vrot.slane %v1483_v5, 7 }
  0xb6   : > { %v352_v58 = vrot.slane %v334_v22, 4  ;;  %v354_v59 = vrot.slane %v335_v24, 3  ;;  %v356_v60 = vrot.slane %v336_v25, 2  ;;  %v358_v61 = vrot.slane %v337_v53, 1 }
  0xb7   : > { %v347_v62 = vsel %vm181_vm0, %v346_v54, %v330_v17  ;;  %v775_v63 = vrot.slane %v1486_v6, 6  ;;  %v777_v8 = vrot.slane %v1489_v7, 5  ;;  %v779_v9 = vrot.slane %v1492_v49, 4 }
  0xb8   : > { %v349_v10 = vsel %vm184_vm1, %v348_v55, %v347_v62  ;;  %v781_v11 = vrot.slane %v1495_v51, 3  ;;  %v783_v12 = vrot.slane %v1498_v13, 2  ;;  %v502_v16 = vmul.f32 %v1454_v28, %v1454_v28 }
  0xb9   : > { %v351_v15 = vsel %vm187_vm2, %v350_v56, %v349_v10  ;;  %v503_v19 = vmul.f32 %v1457_v30, %v1457_v30  ;;  %v504_v23 = vmul.f32 %v1460_v31, %v1460_v31  ;;  %v505_v27 = vmul.f32 %v1463_v33, %v1463_v33 }
  0xba   : > { %v353_v26 = vsel %vm190_vm3, %v352_v58, %v351_v15  ;;  %v506_v29 = vmul.f32 %v1466_v34, %v1466_v34  ;;  %v507_v1 = vmul.f32 %v1469_v35, %v1469_v35  ;;  %v508_v40 = vmul.f32 %v1472_v36, %v1472_v36 }
  0xbb   : > { %v355_v39 = vsel %vm193_vm4, %v354_v59, %v353_v26  ;;  %v509_v2 = vmul.f32 %v1475_v0, %v1475_v0  ;;  %v518_v44 = vrot.slane %v503_v19, 7  ;;  %v520_v3 = vrot.slane %v504_v23, 6 }
  0xbc   : > { %v357_v45 = vsel %vm196_vm5, %v356_v60, %v355_v39  ;;  %v522_v47 = vrot.slane %v505_v27, 5  ;;  %v524_v17 = vrot.slane %v506_v29, 4  ;;  %v526_v21 = vrot.slane %v507_v1, 3 }
  0xbd   : > { %v359_v18 = vsel %vm199_vm6, %v358_v61, %v357_v45  ;;  %v519_v20 = vsel %vm181_vm0, %v518_v44, %v502_v16  ;;  %v528_v22 = vrot.slane %v508_v40, 2  ;;  %v530_v25 = vrot.slane %v509_v2, 1 }
  0xbe   : > { %361 = vadd.xlane.f32.xlu1 %v359_v18  ;;  %v521_v24 = vsel %vm184_vm1, %v520_v3, %v519_v20  ;;  %v822_v53 = vrot.slane %v1457_v30, 7  ;;  %v824_v54 = vrot.slane %v1460_v31, 6  ;;  %v826_v56 = vrot.slane %v1463_v33, 5 }
  0xbf   : > { %v523_v55 = vsel %vm187_vm2, %v522_v47, %v521_v24  ;;  %v828_v58 = vrot.slane %v1466_v34, 4  ;;  %v257_v10 = vrot.slane %v1480_v48, 1  ;;  %v258_v16 = vrot.slane %v1480_v48, 2 }
  0xc0   : > { %v525_v60 = vsel %vm190_vm3, %v524_v17, %v523_v55  ;;  %v259_v19 = vrot.slane %v1480_v48, 3  ;;  %v260_v23 = vrot.slane %v1480_v48, 4  ;;  %v261_v27 = vrot.slane %v1480_v48, 5 }
  0xc1   : > { %v527_v15 = vsel %vm193_vm4, %v526_v21, %v525_v60  ;;  %v262_v29 = vrot.slane %v1480_v48, 6  ;;  %v263_v1 = vrot.slane %v1480_v48, 7  ;;  %v1572_v40 = vsub.f32 %v1402_v32, %v1480_v48 }
  0xc2   : > { %v529_v26 = vsel %vm196_vm5, %v528_v22, %v527_v15  ;;  %v1575_v2 = vsub.f32 %v1410_v37, %v257_v10  ;;  %v1578_v44 = vsub.f32 %v1413_v38, %v258_v16  ;;  %v1581_v45 = vsub.f32 %v1418_v41, %v259_v19 }
  0xc3   : > { %v531_v39 = vsel %vm199_vm6, %v530_v25, %v529_v26  ;;  %v1584_v3 = vsub.f32 %v1421_v42, %v260_v23  ;;  %v1587_v47 = vsub.f32 %v1424_v43, %v261_v27  ;;  %v1590_v17 = vsub.f32 %v1429_v46, %v262_v29 }
  0xc4   : > { %533 = vadd.xlane.f32.xlu1 %v531_v39  ;;  %v1593_v32 = vsub.f32 %v1435_v50, %v263_v1  ;;  %v433_v37 = vmul.f32 %v1572_v40, %v1572_v40  ;;  %v434_v38 = vmul.f32 %v1575_v2, %v1575_v2  ;;  %v435_v41 = vmul.f32 %v1578_v44, %v1578_v44 }
  0xc5   : > { %v436_v42 = vmul.f32 %v1581_v45, %v1581_v45  ;;  %v437_v43 = vmul.f32 %v1584_v3, %v1584_v3  ;;  %v438_v46 = vmul.f32 %v1587_v47, %v1587_v47  ;;  %v439_v50 = vmul.f32 %v1590_v17, %v1590_v17 }
  0xc6   : > { %v440_v48 = vmul.f32 %v1593_v32, %v1593_v32  ;;  %v449_v18 = vrot.slane %v434_v38, 7  ;;  %v451_v20 = vrot.slane %v435_v41, 6  ;;  %v797_v21 = vrot.slane %v1575_v2, 7 }
  0xc7   : > { %v453_v22 = vrot.slane %v436_v42, 5  ;;  %v455_v24 = vrot.slane %v437_v43, 4  ;;  %v457_v25 = vrot.slane %v438_v46, 3  ;;  %v459_v55 = vrot.slane %v439_v50, 2 }
  0xc8   : > { %v450_v60 = vsel %vm181_vm0, %v449_v18, %v433_v37  ;;  %v461_v10 = vrot.slane %v440_v48, 1  ;;  %v799_v15 = vrot.slane %v1578_v44, 6  ;;  %v801_v16 = vrot.slane %v1581_v45, 5 }
  0xc9   : > { %v452_v19 = vsel %vm184_vm1, %v451_v20, %v450_v60  ;;  %v803_v23 = vrot.slane %v1584_v3, 4  ;;  %v399_v39 = vmul.f32 %v1454_v28, %v1478_v4  ;;  %v400_v37 = vmul.f32 %v1457_v30, %v1483_v5 }
  0xca   : > { %v454_v29 = vsel %vm187_vm2, %v453_v22, %v452_v19  ;;  %v401_v41 = vmul.f32 %v1460_v31, %v1486_v6  ;;  %v402_v42 = vmul.f32 %v1463_v33, %v1489_v7  ;;  %v403_v43 = vmul.f32 %v1466_v34, %v1492_v49 }
  0xcb   : > { %v456_v38 = vsel %vm190_vm3, %v455_v24, %v454_v29  ;;  %v404_v50 = vmul.f32 %v1469_v35, %v1495_v51  ;;  %v405_v48 = vmul.f32 %v1472_v36, %v1498_v13  ;;  %v406_v18 = vmul.f32 %v1475_v0, %v1501_v52 }
  0xcc   : > { %v458_v46 = vsel %vm193_vm4, %v457_v25, %v456_v38  ;;  %v415_v22 = vrot.slane %v400_v37, 7  ;;  %v417_v24 = vrot.slane %v401_v41, 6  ;;  %v419_v60 = vrot.slane %v402_v42, 5 }
  0xcd   : > { %v460_v20 = vsel %vm196_vm5, %v459_v55, %v458_v46  ;;  %v421_v29 = vrot.slane %v403_v43, 4  ;;  %v423_v1 = vrot.slane %v404_v50, 3  ;;  %v425_v62 = vrot.slane %v405_v48, 2 }
  0xce   : > { %v462_v19 = vsel %vm199_vm6, %v461_v10, %v460_v20  ;;  %v416_v25 = vsel %vm181_vm0, %v415_v22, %v399_v39  ;;  %v427_v38 = vrot.slane %v406_v18, 1  ;;  %v365_v27 = vmul.f32 %v1572_v40, %v1478_v4 }
  0xcf   : > { %464 = vadd.xlane.f32.xlu0 %v462_v19  ;;  %v366_v61 = vmul.f32 %v1575_v2, %v1483_v5  ;;  %v418_v55 = vsel %vm184_vm1, %v417_v24, %v416_v25  ;;  %v367_v37 = vmul.f32 %v1578_v44, %v1486_v6  ;;  %v368_v10 = vmul.f32 %v1581_v45, %v1489_v7 }
  0xd0   : > { %v369_v41 = vmul.f32 %v1584_v3, %v1492_v49  ;;  %v420_v39 = vsel %vm187_vm2, %v419_v60, %v418_v55  ;;  %v370_v42 = vmul.f32 %v1587_v47, %v1495_v51  ;;  %v371_v43 = vmul.f32 %v1590_v17, %v1498_v13 }
  0xd1   : > { %v372_v46 = vmul.f32 %v1593_v32, %v1501_v52  ;;  %v422_v50 = vsel %vm190_vm3, %v421_v29, %v420_v39  ;;  %v381_v48 = vrot.slane %v366_v61, 7  ;;  %v383_v18 = vrot.slane %v367_v37, 6 }
  0xd2   : > { %v385_v20 = vrot.slane %v368_v10, 5  ;;  %v424_v22 = vsel %vm193_vm4, %v423_v1, %v422_v50  ;;  %v387_v24 = vrot.slane %v369_v41, 4  ;;  %v389_v19 = vrot.slane %v370_v42, 3 }
  0xd3   : > { %v391_v25 = vrot.slane %v371_v43, 2  ;;  %v426_v60 = vsel %vm196_vm5, %v425_v62, %v424_v22  ;;  %v382_v55 = vsel %vm181_vm0, %v381_v48, %v365_v27  ;;  %v393_v14 = vrot.slane %v372_v46, 1 }
  0xd4   : > { %v468_v26 = vmul.f32 %v1454_v28, %v1572_v40  ;;  %v428_v59 = vsel %vm199_vm6, %v427_v38, %v426_v60  ;;  %v384_v29 = vsel %vm184_vm1, %v383_v18, %v382_v55  ;;  %v469_v61 = vmul.f32 %v1457_v30, %v1575_v2 }
  0xd5   : > { %v470_v1 = vmul.f32 %v1460_v31, %v1578_v44  ;;  %430 = vadd.xlane.f32.xlu1 %v428_v59  ;;  %v386_v37 = vsel %vm187_vm2, %v385_v20, %v384_v29  ;;  %v471_v62 = vmul.f32 %v1463_v33, %v1581_v45  ;;  %v472_v27 = vmul.f32 %v1466_v34, %v1584_v3 }
  0xd6   : > { %v473_v38 = vmul.f32 %v1469_v35, %v1587_v47  ;;  %v388_v10 = vsel %vm190_vm3, %v387_v24, %v386_v37  ;;  %v474_v41 = vmul.f32 %v1472_v36, %v1590_v17  ;;  %v475_v39 = vmul.f32 %v1475_v0, %v1593_v32 }
  0xd7   : > { %v484_v59 = vrot.slane %v469_v61, 7  ;;  %v390_v42 = vsel %vm193_vm4, %v389_v19, %v388_v10  ;;  %v486_v43 = vrot.slane %v470_v1, 6  ;;  %v488_v46 = vrot.slane %v471_v62, 5 }
  0xd8   : > { %v490_v50 = vrot.slane %v472_v27, 4  ;;  %v392_v48 = vsel %vm196_vm5, %v391_v25, %v390_v42  ;;  %v492_v20 = vrot.slane %v473_v38, 3  ;;  %v494_v22 = vrot.slane %v474_v41, 2 }
  0xd9   : > { %v485_v18 = vsel %vm181_vm0, %v484_v59, %v468_v26  ;;  %v394_v24 = vsel %vm199_vm6, %v393_v14, %v392_v48  ;;  %v496_v55 = vrot.slane %v475_v39, 1  ;;  %v774_v29 = vsel %vm181_vm0, %v773_v57, %v1478_v4 }
  0xda   : > { %v487_v60 = vsel %vm184_vm1, %v486_v43, %v485_v18  ;;  %396 = vadd.xlane.f32.xlu0 %v394_v24  ;;  %v776_v25 = vsel %vm184_vm1, %v775_v63, %v774_v29  ;;  %v823_v14 = vsel %vm181_vm0, %v822_v53, %v1454_v28  ;;  %v798_v26 = vsel %vm181_vm0, %v797_v21, %v1572_v40 }
  0xdb   : > { %v489_v19 = vsel %vm187_vm2, %v488_v46, %v487_v60  ;;  %v778_v4 = vsel %vm187_vm2, %v777_v8, %v776_v25  ;;  %v825_v6 = vsel %vm184_vm1, %v824_v54, %v823_v14  ;;  %v800_v30 = vsel %vm184_vm1, %v799_v15, %v798_v26 }
  0xdc   : > { %v491_v5 = vsel %vm190_vm3, %v490_v50, %v489_v19  ;;  %v780_v57 = vsel %vm190_vm3, %v779_v9, %v778_v4  ;;  %v827_v7 = vsel %vm187_vm2, %v826_v56, %v825_v6  ;;  %v802_v31 = vsel %vm187_vm2, %v801_v16, %v800_v30 }
  0xdd   : > { %v493_v28 = vsel %vm193_vm4, %v492_v20, %v491_v5  ;;  %v782_v8 = vsel %vm193_vm4, %v781_v11, %v780_v57  ;;  %v829_v49 = vsel %vm190_vm3, %v828_v58, %v827_v7  ;;  %v804_v33 = vsel %vm190_vm3, %v803_v23, %v802_v31 }
  0xde   : > { %v495_v63 = vsel %vm196_vm5, %v494_v22, %v493_v28  ;;  %v784_v53 = vsel %vm196_vm5, %v783_v12, %v782_v8  ;;  %v1934_v54 = vrot.slane %v1469_v35, 3  ;;  %v1935_v11 = vrot.slane %v1587_v47, 3 }
  0xdf   : > { %v497_v9 = vsel %vm199_vm6, %v496_v55, %v495_v63  ;;  %v1936_v56 = vrot.slane %v1501_v52, 1  ;;  %v1937_v40 = vrot.slane %v1472_v36, 2  ;;  %v1938_v12 = vrot.slane %v1590_v17, 2 }
  0xe0   : > { %v831_v51 = vsel %vm193_vm4, %v1934_v54, %v829_v49  ;;  %v806_v34 = vsel %vm193_vm4, %v1935_v11, %v804_v33  ;;  %499 = vadd.xlane.f32.xlu0 %v497_v9  ;;  %v1939_v2 = vrot.slane %v1475_v0, 1  ;;  %v1940_v45 = vrot.slane %v1593_v32, 1 }
  0xe1   : > { %v1748_v58 = vsel %vm199_vm6, %v1936_v56, %v784_v53  ;;  %v833_v13 = vsel %vm196_vm5, %v1937_v40, %v831_v51  ;;  %v808_v35 = vsel %vm196_vm5, %v1938_v12, %v806_v34  ;;  %vm1138_vm2 = vcmask 1040384  }
  0xe2   : > { %v1759_v44 = vsel %vm199_vm6, %v1939_v2, %v833_v13  ;;  %v1764_v52 = vsel %vm199_vm6, %v1940_v45, %v808_v35  ;;  %vm1147_vm3 = vcmask 1041408  }
 0x14b   : > { %v362_v3 = vpop.xlane.xlu1 %361 }
 0x14c   : > { %v363_v21 = vmul.f32 0.0078125, %v362_v3 }
 0x14e   : > { %v1766_v23 = vadd.f32 1e-05, %v363_v21 }
 0x150   : > { %v788_v39 = vmul.f32 %v1748_v58, %v1766_v23 }
 0x151   : > { %v534_v47 = vpop.xlane.xlu1 %533 }
 0x152   : > { %v535_v15 = vmul.f32 0.0078125, %v534_v47 }
 0x154   : > { %v1770_v61 = vadd.f32 3e-05, %v535_v15 }
 0x156   : > { %v851_v28 = vmul.f32 %v1759_v44, %v1770_v61 }
 0x15c   : > { %v465_v36 = vpop.xlane.xlu0 %464 }
 0x15d   : > { %v466_v16 = vmul.f32 0.0078125, %v465_v36 }
 0x15f   : > { %v1768_v17 = vadd.f32 2e-05, %v466_v16 }
 0x161   : > { %v537_v0 = vadd.f32 %v1768_v17, %v1766_v23  ;;  %v842_v46 = vmul.f32 %v1764_v52, %v1768_v17 }
 0x162   : > { %v431_v37 = vpop.xlane.xlu1 %430 }
 0x163   : > { %v538_v32 = vadd.f32 %v537_v0, %v1770_v61  ;;  %v1781_v38 = vmul.f32 0.0078125, %v431_v37 }
 0x165   : > { %v1775_v1 = vmul.f32 0.33333334, %v538_v32  ;;  %v549_v18 = vmul.f32 %v1781_v38, %v1781_v38  ;;  %v837_v22 = vmul.f32 %v1759_v44, %v1781_v38  ;;  %v848_v14 = vmul.f32 %v1748_v58, %v1781_v38 }
 0x167   : > { %v540_v62 = vsub.f32 %v1766_v23, %v1775_v1  ;;  %v541_v27 = vsub.f32 %v1768_v17, %v1775_v1  ;;  %v397_v10 = vpop.xlane.xlu0 %396  ;;  %v542_v43 = vsub.f32 %v1770_v61, %v1775_v1 }
 0x168   : > { %v1783_v41 = vmul.f32 0.0078125, %v397_v10 }
 0x169   : > { %v543_v59 = vmul.f32 %v540_v62, %v540_v62  ;;  %v544_v42 = vmul.f32 %v541_v27, %v541_v27  ;;  %v546_v25 = vmul.f32 %v542_v43, %v542_v43 }
 0x16a   : > { %v812_v50 = vmul.f32 %v1764_v52, %v1783_v41  ;;  %v841_v48 = vmul.f32 %v1748_v58, %v1783_v41  ;;  %v548_v20 = vmul.f32 %v1783_v41, %v1783_v41 }
 0x16b   : > { %v545_v29 = vadd.f32 %v544_v42, %v543_v59 }
 0x16c   : > { %v813_v24 = vadd.f32 %v812_v50, %v788_v39  ;;  %v843_v60 = vadd.f32 %v842_v46, %v841_v48  ;;  %v550_v5 = vadd.f32 %v549_v18, %v548_v20 }
 0x16d   : > { %v500_v55 = vpop.xlane.xlu0 %499  ;;  %v547_v57 = vadd.f32 %v546_v25, %v545_v29 }
 0x16e   : > { %v1801_v19 = vmul.f32 0.0078125, %v500_v55  ;;  %v1805_v26 = vadd.f32 %v837_v22, %v813_v24 }
 0x170   : > { %v551_v4 = vmul.f32 %v1801_v19, %v1801_v19  ;;  %v844_v6 = vmul.f32 %v1759_v44, %v1801_v19  ;;  %v849_v30 = vmul.f32 %v1764_v52, %v1801_v19 }
 0x172   : > { %v552_v7 = vadd.f32 %v551_v4, %v550_v5  ;;  %v1815_v31 = vadd.f32 %v844_v6, %v843_v60  ;;  %v850_v63 = vadd.f32 %v849_v30, %v848_v14 }
 0x174   : > { %v553_v8 = vmul.f32 2.0, %v552_v7  ;;  %v1817_v49 = vadd.f32 %v851_v28, %v850_v63 }
 0x176   : > { %v554_v33 = vadd.f32 %v553_v8, %v547_v57 }
 0x178   : > { %v555_v9 = vmul.f32 0.16666667, %v554_v33 }
 0x17a   : > { %1256 = vrsqrt.f32 %v555_v9  ;;  %vm558_vm7 = vcmp.eq.f32.partialorder %v555_v9, inf  ;;  %v561_v51 = vand.u32 2147483648, %v555_v9  ;;  %vm560_vm8 = vcmp.eq.f32.partialorder %v555_v9, 0.0 }
 0x184   : > { %v1257_v53 = vpop.eup %1256 }
 0x185   : > { %v557_v54 = vmul.f32 %v1257_v53, %v555_v9 }
 0x187   : > { %v559_v11 = vsel %vm558_vm7, %v555_v9, %v557_v54 }
 0x188   : > { %v1819_v34 = vsel %vm560_vm8, %v561_v51, %v559_v11 }
 0x189   : > { %v564_v56 = vmax.f32 %v1819_v34, 1e-20  ;;  %vm563_vm9 = vcmp.gt.f32.partialorder %v1819_v34, 1e-20 }
 0x18b   : > { %1258 = vrcp.f32 %v564_v56 }
 0x195   : > { %v1259_v40 = vpop.eup %1258 }
 0x196   : > { %v567_v13 = vsel %vm563_vm9, %v1259_v40, 0.0 }
 0x197   : > { %v569_v12 = vmul.f32 %v567_v13, %v541_v27  ;;  %v570_v35 = vmul.f32 %v567_v13, %v542_v43  ;;  %v571_v2 = vmul.f32 %v567_v13, %v1783_v41  ;;  %v572_v45 = vmul.f32 %v567_v13, %v1781_v38 }
 0x198   : > { %v573_v3 = vmul.f32 %v567_v13, %v1801_v19  ;;  %v568_v32 = vmul.f32 %v567_v13, %v540_v62 }
 0x199   : > { %v574_v47 = vmul.f32 %v570_v35, %v569_v12  ;;  %v578_v21 = vmul.f32 %v571_v2, %v570_v35  ;;  %v584_v0 = vmul.f32 %v572_v45, %v569_v12 }
 0x19a   : > { %v575_v36 = vmul.f32 %v573_v3, %v573_v3  ;;  %v579_v15 = vmul.f32 %v573_v3, %v572_v45  ;;  %v583_v16 = vmul.f32 %v573_v3, %v571_v2 }
 0x19c   : > { %v576_v37 = vsub.f32 %v574_v47, %v575_v36  ;;  %v580_v10 = vsub.f32 %v578_v21, %v579_v15  ;;  %v585_v39 = vsub.f32 %v583_v16, %v584_v0 }
 0x19e   : > { %v577_v59 = vmul.f32 %v576_v37, %v568_v32  ;;  %v581_v42 = vmul.f32 %v580_v10, %v571_v2  ;;  %v586_v43 = vmul.f32 %v585_v39, %v572_v45 }
 0x1a0   : > { %v582_v27 = vsub.f32 %v577_v59, %v581_v42 }
 0x1a2   : > { %v587_v46 = vadd.f32 %v586_v43, %v582_v27 }
 0x1a4   : > { %v588_v50 = vmul.f32 0.5, %v587_v46 }
 0x1a6   : > { %v1826_v48 = vclamps-f32 %v588_v50, 1.0 }
 0x1a8   : > { %v591_v18 = vadd.f32 1.0, %v1826_v48  ;;  %vm602_vm12 = vcmp.lt.f32.partialorder %v1826_v48, -0.5 }
 0x1aa   : > { %v592_v20 = vmax.f32 %v591_v18, 0.0 }
 0x1ac   : > { %v593_v22 = vmul.f32 0.16666667, %v592_v20 }
 0x1ae   : > { %1260 = vrsqrt.f32 %v593_v22  ;;  %vm596_vm10 = vcmp.eq.f32.partialorder %v593_v22, inf  ;;  %v599_v62 = vand.u32 2147483648, %v593_v22  ;;  %vm598_vm11 = vcmp.eq.f32.partialorder %v593_v22, 0.0 }
 0x1b8   : > { %v1261_v24 = vpop.eup %1260 }
 0x1b9   : > { %v595_v60 = vmul.f32 %v1261_v24, %v593_v22 }
 0x1bb   : > { %v597_v55 = vsel %vm596_vm10, %v593_v22, %v595_v60 }
 0x1bc   : > { %v600_v29 = vsel %vm598_vm11, %v599_v62, %v597_v55 }
 0x1bd   : > { %v601_v25 = vadd.f32 0.5, %v600_v29 }
 0x1bf   : > { %v603_v14 = vsel %vm602_vm12, %v601_v25, 1.0 }
 0x1c0   : > { %v604_v5 = vmul.f32 %v603_v14, %v603_v14 }
 0x1c2   : > { %v609_v4 = vmul.f32 12.0, %v604_v5  ;;  %v605_v30 = vmul.f32 4.0, %v604_v5 }
 0x1c4   : > { %v1231_v6 = vadd.f32 -3.0, %v609_v4  ;;  %v1230_v57 = vadd.f32 -3.0, %v605_v30 }
 0x1c6   : > { %v611_v28 = vmax.f32 %v1231_v6, 1e-06  ;;  %v607_v7 = vmul.f32 %v1230_v57, %v603_v14 }
 0x1c8   : > { %1262 = vrcp.f32 %v611_v28  ;;  %v608_v63 = vsub.f32 %v607_v7, %v1826_v48 }
 0x1d2   : > { %v1263_v8 = vpop.eup %1262 }
 0x1d3   : > { %v613_v33 = vmul.f32 %v1263_v8, %v608_v63 }
 0x1d5   : > { %v614_v9 = vsub.f32 %v603_v14, %v613_v33 }
 0x1d7   : > { %v615_v53 = vmul.f32 %v614_v9, %v614_v9 }
 0x1d9   : > { %v620_v54 = vmul.f32 12.0, %v615_v53  ;;  %v616_v11 = vmul.f32 4.0, %v615_v53 }
 0x1db   : > { %v1233_v51 = vadd.f32 -3.0, %v620_v54  ;;  %v1232_v40 = vadd.f32 -3.0, %v616_v11 }
 0x1dd   : > { %v622_v56 = vmax.f32 %v1233_v51, 1e-06  ;;  %v618_v13 = vmul.f32 %v1232_v40, %v614_v9 }
 0x1df   : > { %1264 = vrcp.f32 %v622_v56  ;;  %v619_v12 = vsub.f32 %v618_v13, %v1826_v48 }
 0x1e9   : > { %v1265_v35 = vpop.eup %1264 }
 0x1ea   : > { %v624_v2 = vmul.f32 %v1265_v35, %v619_v12 }
 0x1ec   : > { %v625_v45 = vsub.f32 %v614_v9, %v624_v2 }
 0x1ee   : > { %v626_v3 = vmul.f32 %v625_v45, %v625_v45 }
 0x1f0   : > { %v631_v47 = vmul.f32 12.0, %v626_v3  ;;  %v627_v36 = vmul.f32 4.0, %v626_v3 }
 0x1f2   : > { %v1235_v21 = vadd.f32 -3.0, %v631_v47  ;;  %v1234_v16 = vadd.f32 -3.0, %v627_v36 }
 0x1f4   : > { %v633_v15 = vmax.f32 %v1235_v21, 1e-06  ;;  %v629_v0 = vmul.f32 %v1234_v16, %v625_v45 }
 0x1f6   : > { %1266 = vrcp.f32 %v633_v15  ;;  %v630_v32 = vsub.f32 %v629_v0, %v1826_v48 }
 0x200   : > { %v1267_v37 = vpop.eup %1266 }
 0x201   : > { %v635_v10 = vmul.f32 %v1267_v37, %v630_v32 }
 0x203   : > { %v636_v39 = vsub.f32 %v625_v45, %v635_v10 }
 0x205   : > { %v637_v59 = vmul.f32 %v636_v39, %v636_v39 }
 0x207   : > { %v642_v42 = vmul.f32 12.0, %v637_v59  ;;  %v638_v43 = vmul.f32 4.0, %v637_v59 }
 0x209   : > { %v1237_v27 = vadd.f32 -3.0, %v642_v42  ;;  %v1236_v50 = vadd.f32 -3.0, %v638_v43 }
 0x20b   : > { %v644_v46 = vmax.f32 %v1237_v27, 1e-06  ;;  %v640_v18 = vmul.f32 %v1236_v50, %v636_v39  ;;  %v693_v27 = vmul.f32 2.0, %v1819_v34 }
 0x20d   : > { %1268 = vrcp.f32 %v644_v46  ;;  %v641_v20 = vsub.f32 %v640_v18, %v1826_v48 }
 0x217   : > { %v1269_v22 = vpop.eup %1268 }
 0x218   : > { %v646_v24 = vmul.f32 %v1269_v22, %v641_v20 }
 0x21a   : > { %v647_v60 = vsub.f32 %v636_v39, %v646_v24  ;;  %v700_v24 = vmul.f32 3.0, %v1775_v1 }
 0x21c   : > { %v648_v62 = vmul.f32 %v647_v60, %v647_v60 }
 0x21e   : > { %v653_v55 = vmul.f32 12.0, %v648_v62  ;;  %v649_v25 = vmul.f32 4.0, %v648_v62 }
 0x220   : > { %v1239_v29 = vadd.f32 -3.0, %v653_v55  ;;  %v1238_v5 = vadd.f32 -3.0, %v649_v25 }
 0x222   : > { %v655_v14 = vmax.f32 %v1239_v29, 1e-06  ;;  %v651_v4 = vmul.f32 %v1238_v5, %v647_v60 }
 0x224   : > { %1270 = vrcp.f32 %v655_v14  ;;  %v652_v6 = vsub.f32 %v651_v4, %v1826_v48 }
 0x22e   : > { %v1271_v30 = vpop.eup %1270 }
 0x22f   : > { %v657_v28 = vmul.f32 %v1271_v30, %v652_v6 }
 0x231   : > { %v658_v57 = vsub.f32 %v647_v60, %v657_v28 }
 0x233   : > { %v659_v7 = vmul.f32 %v658_v57, %v658_v57 }
 0x235   : > { %v664_v63 = vmul.f32 12.0, %v659_v7  ;;  %v660_v33 = vmul.f32 4.0, %v659_v7 }
 0x237   : > { %v1241_v8 = vadd.f32 -3.0, %v664_v63  ;;  %v1240_v53 = vadd.f32 -3.0, %v660_v33 }
 0x239   : > { %v666_v9 = vmax.f32 %v1241_v8, 1e-06  ;;  %v662_v54 = vmul.f32 %v1240_v53, %v658_v57 }
 0x23b   : > { %1272 = vrcp.f32 %v666_v9  ;;  %v663_v51 = vsub.f32 %v662_v54, %v1826_v48 }
 0x245   : > { %v1273_v11 = vpop.eup %1272 }
 0x246   : > { %v668_v56 = vmul.f32 %v1273_v11, %v663_v51 }
 0x248   : > { %v669_v40 = vsub.f32 %v658_v57, %v668_v56 }
 0x24a   : > { %v670_v13 = vmul.f32 %v669_v40, %v669_v40 }
 0x24c   : > { %v675_v12 = vmul.f32 12.0, %v670_v13  ;;  %v671_v2 = vmul.f32 4.0, %v670_v13 }
 0x24e   : > { %v1243_v35 = vadd.f32 -3.0, %v675_v12  ;;  %v1242_v3 = vadd.f32 -3.0, %v671_v2 }
 0x250   : > { %v677_v45 = vmax.f32 %v1243_v35, 1e-06  ;;  %v673_v47 = vmul.f32 %v1242_v3, %v669_v40 }
 0x252   : > { %1274 = vrcp.f32 %v677_v45  ;;  %v674_v21 = vsub.f32 %v673_v47, %v1826_v48 }
 0x25c   : > { %v1275_v36 = vpop.eup %1274 }
 0x25d   : > { %v679_v15 = vmul.f32 %v1275_v36, %v674_v21 }
 0x25f   : > { %v680_v16 = vsub.f32 %v669_v40, %v679_v15 }
 0x261   : > { %v681_v0 = vmax.f32 %v680_v16, 0.5 }
 0x263   : > { %v682_v32 = vmin.f32 %v681_v0, 1.0 }
 0x265   : > { %v683_v37 = vmul.f32 %v682_v32, %v682_v32  ;;  %v694_v50 = vmul.f32 %v693_v27, %v682_v32 }
 0x267   : > { %v684_v10 = vsub.f32 1.0, %v683_v37  ;;  %v1839_v20 = vadd.f32 %v694_v50, %v1775_v1 }
 0x269   : > { %v685_v39 = vmax.f32 %v684_v10, 0.0  ;;  %v701_v55 = vsub.f32 %v700_v24, %v1839_v20  ;;  %v703_v25 = vadd.f32 1e-05, %v1839_v20  ;;  %v715_v3 = vand.u32 2147483647, %v1839_v20 }
 0x26b   : > { %1276 = vrsqrt.f32 %v685_v39  ;;  %vm688_vm13 = vcmp.eq.f32.partialorder %v685_v39, inf  ;;  %v691_v43 = vand.u32 2147483648, %v685_v39  ;;  %vm690_vm14 = vcmp.eq.f32.partialorder %v685_v39, 0.0 }
 0x26c   : > { %v704_v28 = vmax.f32 %v703_v25, 1e-20 }
 0x275   : > { %v1277_v59 = vpop.eup %1276 }
 0x276   : > { %v687_v42 = vmul.f32 %v1277_v59, %v685_v39 }
 0x278   : > { %v689_v46 = vsel %vm688_vm13, %v685_v39, %v687_v42 }
 0x279   : > { %v692_v18 = vsel %vm690_vm14, %v691_v43, %v689_v46 }
 0x27a   : > { %v696_v48 = vmul.f32 1.7320508, %v692_v18 }
 0x27c   : > { %v697_v22 = vadd.f32 %v696_v48, %v682_v32 }
 0x27e   : > { %v698_v60 = vmul.f32 %v697_v22, %v1819_v34 }
 0x280   : > { %v699_v62 = vsub.f32 %v1775_v1, %v698_v60 }
 0x282   : > { %v702_v29 = vsub.f32 %v701_v55, %v699_v62  ;;  %v709_v5 = vadd.f32 1e-05, %v699_v62  ;;  %v714_v45 = vsub.f32 %v1839_v20, %v699_v62  ;;  %v720_v47 = vand.u32 2147483647, %v699_v62 }
 0x284   : > { %v706_v14 = vadd.f32 1e-05, %v702_v29  ;;  %v727_v4 = vadd.f32 %v702_v29, %v1839_v20  ;;  %v732_v6 = vadd.f32 %v702_v29, %v699_v62  ;;  %v1848_v63 = vmul.f32 %v1748_v58, %v702_v29 }
 0x285   : > { %v710_v34 = vmax.f32 %v709_v5, 1e-20  ;;  %v712_v1 = vsub.f32 %v1839_v20, %v702_v29  ;;  %v713_v53 = vsub.f32 %v702_v29, %v699_v62  ;;  %v846_v11 = vmul.f32 %v1764_v52, %v702_v29 }
 0x286   : > { %v707_v30 = vmax.f32 %v706_v14, 1e-20  ;;  %v728_v57 = vmul.f32 0.5, %v727_v4  ;;  %v733_v7 = vmul.f32 0.5, %v732_v6  ;;  %v840_v9 = vsub.f32 %v1805_v26, %v1848_v63 }
 0x287   : > { %v853_v56 = vmul.f32 %v1759_v44, %v702_v29  ;;  %v716_v40 = vand.u32 2147483647, %v702_v29  ;;  %v739_v13 = vmax.f32 %v712_v1, 1e-30  ;;  %v847_v12 = vsub.f32 %v1815_v31, %v846_v11 }
 0x288   : > { %1278 = vrsqrt.f32 %v707_v30  ;;  %v729_v8 = vadd.f32 1e-05, %v728_v57  ;;  %v734_v33 = vadd.f32 1e-05, %v733_v7  ;;  %v748_v2 = vmax.f32 %v713_v53, 1e-30 }
 0x289   : > { %1280 = vrsqrt.f32 %v704_v28  ;;  %v854_v35 = vsub.f32 %v1817_v49, %v853_v56  ;;  %v717_v21 = vadd.f32 %v716_v40, %v715_v3  ;;  %v721_v36 = vadd.f32 %v720_v47, %v716_v40 }
 0x28a   : > { %v730_v54 = vmax.f32 %v729_v8, 1e-20  ;;  %v735_v51 = vmax.f32 %v734_v33, 1e-20  ;;  %1282 = vrsqrt.f32 %v710_v34  ;;  %v758_v16 = vmax.f32 %v714_v45, 1e-30 }
 0x28b   : > { %v718_v32 = vadd.f32 2e-05, %v717_v21  ;;  %v722_v31 = vadd.f32 2e-05, %v721_v36  ;;  %v724_v39 = vadd.f32 %v720_v47, %v715_v3  ;;  %v1302_v3 = vmov 1966171168  }
 0x28c   : > { %1284 = vrsqrt.f32 %v730_v54  ;;  %v903_v47 = vunpack.c.l.s4 %v1302_v3  ;;  %v905_v21 = vlaneseq }
 0x28d   : > { %1286 = vrsqrt.f32 %v735_v51  ;;  %v719_v43 = vmul.f32 0.0004, %v718_v32  ;;  %v723_v18 = vmul.f32 0.0004, %v722_v31  ;;  %v725_v60 = vadd.f32 2e-05, %v724_v39 }
 0x28e   : > { %1288 = vrcp.f32 %v739_v13  ;;  %v906_v32 = vshrl.u32 %v905_v21, 7 }
 0x28f   : > { %1290 = vrcp.f32 %v748_v2  ;;  %vm737_vm15 = vcmp.gt.f32.partialorder %v712_v1, %v719_v43  ;;  %vm746_vm0 = vcmp.gt.f32.partialorder %v713_v53, %v723_v18  ;;  %v726_v30 = vmul.f32 0.0004, %v725_v60 }
 0x290   : > { %1292 = vrcp.f32 %v758_v16 }
 0x291   : > { %vm756_vm1 = vcmp.gt.f32.partialorder %v714_v45, %v726_v30 }
 0x292   : > { %v1279_v15 = vpop.eup %1278 }
 0x293   : > { %v1859_v0 = vpop.eup %1280  ;;  %v755_v10 = vmul.f32 %v1279_v15, %v1279_v15 }
 0x294   : > { %v1283_v37 = vpop.eup %1282  ;;  %v738_v42 = vsub.f32 %v1859_v0, %v1279_v15 }
 0x295   : > { %v747_v46 = vsub.f32 %v1279_v15, %v1283_v37  ;;  %v761_v22 = vmul.f32 0.375, %v755_v10 }
 0x296   : > { %v1285_v49 = vpop.eup %1284 }
 0x297   : > { %v1287_v59 = vpop.eup %1286  ;;  %v742_v27 = vmul.f32 -0.5, %v1285_v49  ;;  %v762_v6 = vmul.f32 %v761_v22, %v755_v10 }
 0x298   : > { %v751_v50 = vmul.f32 -0.5, %v1287_v59  ;;  %v1289_v24 = vpop.eup %1288 }
 0x299   : > { %v743_v48 = vmul.f32 %v1285_v49, %v742_v27  ;;  %v1291_v55 = vpop.eup %1290  ;;  %v741_v29 = vmul.f32 %v1289_v24, %v738_v42  ;;  %v763_v8 = vmul.f32 %v1279_v15, %v762_v6  ;;  %v885_v27 = vmul.f32 %v1859_v0, %v1748_v58 }
 0x29a   : > { %v752_v62 = vmul.f32 %v1287_v59, %v751_v50  ;;  %v750_v14 = vmul.f32 %v1291_v55, %v747_v46  ;;  %v1293_v7 = vpop.eup %1292  ;;  %v894_v46 = vmul.f32 %v1859_v0, %v1764_v52 }
 0x29b   : > { %v744_v25 = vmul.f32 %v1285_v49, %v743_v48  ;;  %v897_v48 = vmul.f32 %v1859_v0, %v1759_v44 }
 0x29c   : > { %v753_v5 = vmul.f32 %v1287_v59, %v752_v62 }
 0x29d   : > { %v745_v4 = vsel %vm737_vm15, %v741_v29, %v744_v25  ;;  %v1889_v29 = vsub.s32 0, %v906_v32 }
 0x29e   : > { %v754_v28 = vsel %vm746_vm0, %v750_v14, %v753_v5  ;;  %v855_v54 = vmul.f32 %v1748_v58, %v745_v4  ;;  %v858_v51 = vmul.f32 %v1764_v52, %v745_v4  ;;  %v861_v53 = vmul.f32 %v1759_v44, %v745_v4 }
 0x29f   : > { %v757_v57 = vsub.f32 %v745_v4, %v754_v28 }
 0x2a1   : > { %v760_v34 = vmul.f32 %v1293_v7, %v757_v57 }
 0x2a3   : > { %v764_v33 = vsel %vm756_vm1, %v760_v34, %v763_v8 }
 0x2a4   : > { %v856_v1 = vmul.f32 %v840_v9, %v764_v33  ;;  %v859_v11 = vmul.f32 %v847_v12, %v764_v33  ;;  %v862_v56 = vmul.f32 %v854_v35, %v764_v33  ;;  %v904_v35 = vunpack.c.0.s8 %v903_v47 }
 0x2a6   : > { %v857_v40 = vadd.f32 %v856_v1, %v855_v54  ;;  %v860_v13 = vadd.f32 %v859_v11, %v858_v51  ;;  %v863_v2 = vadd.f32 %v862_v56, %v861_v53  ;;  %v907_v50 = vsub.s32 %v904_v35, %v906_v32 }
 0x2a8   : > { %v864_v45 = vmul.f32 %v857_v40, %v1766_v23  ;;  %v865_v36 = vmul.f32 %v860_v13, %v1783_v41  ;;  %v871_v15 = vmul.f32 %v857_v40, %v1783_v41  ;;  %v872_v16 = vmul.f32 %v860_v13, %v1768_v17 }
 0x2a9   : > { %v867_v63 = vmul.f32 %v863_v2, %v1781_v38  ;;  %v878_v9 = vmul.f32 %v857_v40, %v1781_v38  ;;  %v879_v12 = vmul.f32 %v860_v13, %v1801_v19  ;;  %v874_v31 = vmul.f32 %v863_v2, %v1801_v19  ;;  %v1244_v19 = vld [vmem:[%s1932_s1] ss:$0 sm:$0xff] }
 0x2aa   : > { %v866_v26 = vadd.f32 %v865_v36, %v864_v45  ;;  %v873_v37 = vadd.f32 %v872_v16, %v871_v15  ;;  %v869_v23 = vmul.f32 %v857_v40, %v1839_v20  ;;  %v881_v41 = vmul.f32 %v863_v2, %v1770_v61 }
 0x2ab   : > { %v880_v49 = vadd.f32 %v879_v12, %v878_v9  ;;  %v876_v17 = vmul.f32 %v860_v13, %v1839_v20  ;;  %v883_v38 = vmul.f32 %v863_v2, %v1839_v20 }
 0x2ac   : > { %v868_v10 = vadd.f32 %v867_v63, %v866_v26  ;;  %v875_v39 = vadd.f32 %v874_v31, %v873_v37 }
 0x2ad   : > { %v882_v42 = vadd.f32 %v881_v41, %v880_v49 }
 0x2ae   : > { %v870_v59 = vsub.f32 %v868_v10, %v869_v23  ;;  %v877_v43 = vsub.f32 %v875_v39, %v876_v17 }
 0x2af   : > { %v884_v61 = vsub.f32 %v882_v42, %v883_v38 }
 0x2b0   : > { %v886_v18 = vadd.f32 %v885_v27, %v870_v59  ;;  %v895_v22 = vadd.f32 %v894_v46, %v877_v43 }
 0x2b1   : > { %v898_v20 = vadd.f32 %v897_v48, %v884_v61 }
 0x2b2   : > { %v893_v24 = vmul.f32 %v1244_v19, %v886_v18  ;;  %v896_v60 = vmul.f32 %v1244_v19, %v895_v22 }
 0x2b3   : > { %v899_v62 = vmul.f32 %v1244_v19, %v898_v20 }
 0x2b4   : > { %v901_v58 = vcombine.high %v893_v24, %v893_v24  ;;  %v908_v55 = vrot.slane %v893_v24, %v907_v50  ;;  %v959_v25 = vcombine.high %v896_v60, %v896_v60  ;;  %v966_v14 = vrot.slane %v896_v60, %v907_v50 }
 0x2b5   : > { %v1009_v6 = vcombine.high %v899_v62, %v899_v62  ;;  %v1016_v44 = vrot.slane %v899_v62, %v907_v50 }
 0x2b6   : > { %v915_v5 = vrot.slane %v901_v58, %v907_v50  ;;  %v916_v4 = vcombine.high %v908_v55, %v908_v55  ;;  %v924_v52 = vrot.slane %v908_v55, %v907_v50  ;;  %v973_v30 = vrot.slane %v959_v25, %v907_v50 }
 0x2b7   : > { %v974_v28 = vcombine.high %v966_v14, %v966_v14  ;;  %v982_v57 = vrot.slane %v966_v14, %v907_v50  ;;  %v1023_v40 = vrot.slane %v1009_v6, %v907_v50  ;;  %v1024_v47 = vcombine.high %v1016_v44, %v1016_v44 }
 0x2b8   : > { %v917_v0 = vcombine.high %v915_v5, %v915_v5  ;;  %v931_v7 = vrot.slane %v915_v5, %v907_v50  ;;  %v938_v34 = vrot.slane %v916_v4, %v907_v50  ;;  %v946_v8 = vcombine.high %v924_v52, %v924_v52 }
 0x2b9   : > { %v975_v33 = vcombine.high %v973_v30, %v973_v30  ;;  %v989_v54 = vrot.slane %v973_v30, %v907_v50  ;;  %v996_v51 = vrot.slane %v974_v28, %v907_v50  ;;  %v1004_v1 = vcombine.high %v982_v57, %v982_v57 }
 0x2ba   : > { %v945_v11 = vrot.slane %v917_v0, %v907_v50  ;;  %v947_v53 = vcombine.high %v931_v7, %v931_v7  ;;  %v948_v56 = vcombine.high %v938_v34, %v938_v34  ;;  %v1025_v45 = vcombine.high %v1023_v40, %v1023_v40 }
 0x2bb   : > { %v1003_v13 = vrot.slane %v975_v33, %v907_v50  ;;  %v1005_v2 = vcombine.high %v989_v54, %v989_v54  ;;  %v1006_v3 = vcombine.high %v996_v51, %v996_v51  ;;  %v1032_v36 = vrot.slane %v1016_v44, %v907_v50 }
 0x2bc   : > { %v949_v21 = vcombine.high %v945_v11, %v945_v11  ;;  %v1039_v15 = vrot.slane %v1023_v40, %v907_v50  ;;  %v1046_v26 = vrot.slane %v1024_v47, %v907_v50  ;;  %v1061_v63 = vrot.slane %v982_v57, %v1889_v29 }
 0x2bd   : > { %v1007_v16 = vcombine.high %v1003_v13, %v1003_v13  ;;  %v1065_v9 = vrot.slane %v996_v51, %v1889_v29  ;;  %v1053_v12 = vrot.slane %v1025_v45, %v907_v50  ;;  %v1054_v35 = vcombine.high %v1032_v36, %v1032_v36 }
 0x2be   : > { %v1055_v32 = vcombine.high %v1039_v15, %v1039_v15  ;;  %v1069_v37 = vrot.slane %v1004_v1, %v1889_v29  ;;  %v1056_v31 = vcombine.high %v1046_v26, %v1046_v26  ;;  %v1073_v10 = vrot.slane %v1006_v3, %v1889_v29 }
 0x2bf   : > { %v1077_v23 = vrot.slane %v989_v54, %v1889_v29  ;;  %v1081_v49 = vrot.slane %v1003_v13, %v1889_v29  ;;  %v1057_v41 = vcombine.high %v1053_v12, %v1053_v12  ;;  %v1085_v39 = vrot.slane %v1005_v2, %v1889_v29 }
 0x2c0   : > { %v1089_v17 = vrot.slane %v1007_v16, %v1889_v29  ;;  %v1101_v59 = vrot.slane %v1032_v36, %v1889_v29  ;;  %v1105_v42 = vrot.slane %v1046_v26, %v1889_v29  ;;  %v1109_v38 = vrot.slane %v1054_v35, %v1889_v29 }
 0x2c1   : > { %v1113_v27 = vrot.slane %v1056_v31, %v1889_v29  ;;  %v1117_v19 = vrot.slane %v1039_v15, %v1889_v29  ;;  %v1121_v43 = vrot.slane %v1053_v12, %v1889_v29  ;;  %v1125_v46 = vrot.slane %v1055_v32, %v1889_v29 }
 0x2c2   : > { %v1129_v50 = vrot.slane %v1057_v41, %v1889_v29  ;;  %v1139_v61 = vsel %vm1138_vm2, %v924_v52, %v1061_v63  ;;  %v1140_v18 = vsel %vm1138_vm2, %v938_v34, %v1065_v9  ;;  %v1141_v48 = vsel %vm1138_vm2, %v946_v8, %v1069_v37 }
 0x2c3   : > { %v1142_v22 = vsel %vm1138_vm2, %v948_v56, %v1073_v10  ;;  %v1143_v24 = vsel %vm1138_vm2, %v931_v7, %v1077_v23  ;;  %v1144_v20 = vsel %vm1138_vm2, %v945_v11, %v1081_v49  ;;  %v1145_v60 = vsel %vm1138_vm2, %v947_v53, %v1085_v39 }
 0x2c4   : > { %v1146_v62 = vsel %vm1138_vm2, %v949_v21, %v1089_v17  ;;  %v1148_v58 = vsel %vm1147_vm3, %v1139_v61, %v1101_v59  ;;  %v1149_v55 = vsel %vm1147_vm3, %v1140_v18, %v1105_v42  ;;  %v1150_v29 = vsel %vm1147_vm3, %v1141_v48, %v1109_v38 }
 0x2c5   : > { %v1151_v25 = vsel %vm1147_vm3, %v1142_v22, %v1113_v27  ;;  %v1152_v14 = vsel %vm1147_vm3, %v1143_v24, %v1117_v19  ;;  %1156 = vst [vmem:[%s145_s20] sm:$0x7] %v1148_v58  ;;  %v1153_v5 = vsel %vm1147_vm3, %v1144_v20, %v1121_v43  ;;  %v1154_v4 = vsel %vm1147_vm3, %v1145_v60, %v1125_v46 }
 0x2c6   : > { %v1155_v52 = vsel %vm1147_vm3, %v1146_v62, %v1129_v50  ;;  %1157 = vst [vmem:[%s145_s20 + $0x4] sm:$0x7] %v1149_v55  ;;  %1158 = vst [vmem:[%s145_s20 + $0x8] sm:$0x7] %v1150_v29 }
 0x2c7   : > { %1159 = vst [vmem:[%s145_s20 + $0xc] sm:$0x7] %v1151_v25  ;;  %1160 = vst [vmem:[%s145_s20 + $0x10] sm:$0x7] %v1152_v14 }
 0x2c8   : > { %1161 = vst [vmem:[%s145_s20 + $0x14] sm:$0x7] %v1153_v5  ;;  %1162 = vst [vmem:[%s145_s20 + $0x18] sm:$0x7] %v1154_v4 }
 0x2c9   : > { %1163 = vst [vmem:[%s145_s20 + $0x1c] sm:$0x7] %v1155_v52 }
 0x2ca PF: > { %s12_s9 = sadd.s32 1, %s1300_s9  }
 0x2cb   : > { %p9_p4 = scmp.ge.s32.totalorder %s12_s9, 4  }
 0x2cd   :  { %11 = sbr.rel (!%p9_p4) target bundleno = 1 (0x1), region = 58 }

</bundles_post_ra>
